<compile_context>
chip_gen: v6e
topology: v6e:2x2x1
jax: 0.10.0
libtpu: 0.0.40
codegen_flags: <defaults>
</compile_context>

<pallas_src>
import functools

import jax
import jax.numpy as jnp
from jax import lax
from jax.experimental import pallas as pl
from jax.experimental.pallas import tpu as pltpu


def _debias_supcon_kernel(contrast_ref, mask_ref, diag_ref, out_ref, *, inv_temperature):
    """Hot path for one row tile of anchors.

    contrast_ref: [N, D]   full contrast feature matrix (bf16, VMEM-resident)
    mask_ref:     [tm, B]  per-batch positive mask rows for this tile
                           (label_eq * (1 - cos_sim(bias)); diagonal NOT pre-zeroed)
    diag_ref:     [tm, 1]  mask_bb[b, b] for each anchor row (self-column mask value)
    out_ref:      [tm, 1]  per-anchor loss (f32)
    """
    i = pl.program_id(0)
    tm, b = mask_ref.shape
    n, _ = contrast_ref.shape
    v = n // b  # number of contrast views (static)

    # Anchor rows are a slice of the resident contrast matrix (no extra HBM stream).
    row_start = pl.multiple_of(i * tm, tm)
    anchor = contrast_ref[pl.ds(row_start, tm), :]            # [tm, D]  bf16
    contrast = contrast_ref[...]                              # [N,  D]  bf16

    # logits = (A @ C^T) * (1/T)   (bf16 MXU inputs, f32 accumulate)
    logits = lax.dot_general(
        anchor, contrast, (((1,), (1,)), ((), ())),
        preferred_element_type=jnp.float32) * inv_temperature  # [tm, N]

    row_max = jnp.max(logits, axis=1, keepdims=True)            # [tm, 1] (XLU)
    shifted = logits - row_max                                   # [tm, N] (one VPU pass)

    # Softmax denominator with the self-contrast column removed as a per-row scalar
    # correction (replaces the v1 [tm,N] iota + compare + select: 3 full-width passes).
    anchor_f32 = anchor.astype(jnp.float32)
    self_logit = inv_temperature * jnp.sum(anchor_f32 * anchor_f32,
                                           axis=1, keepdims=True)        # [tm, 1]
    self_shifted = self_logit - row_max                                   # [tm, 1]
    denom = jnp.sum(jnp.exp(shifted), axis=1, keepdims=True) - jnp.exp(self_shifted)
    log_denom = jnp.log(jnp.maximum(denom, 0.0) + 1e-9)                   # [tm, 1]

    # Fold the shifted logits over the V contrast-view column blocks: the positive mask
    # is identical for every view block, so all masked work becomes B-wide, not N-wide.
    # Static slices; B is a lane multiple in the intended configs.
    lp_b = shifted[:, 0:b]
    for view in range(1, v):
        lp_b = lp_b + shifted[:, view * b:(view + 1) * b]                 # [tm, B]

    mask_nb = mask_ref[...]                                               # [tm, B]
    diag_m = diag_ref[...]                                                # [tm, 1]
    sum_mask_b = jnp.sum(mask_nb, axis=1, keepdims=True)                  # [tm, 1]
    sum_mask = float(v) * sum_mask_b - diag_m      # exclude the (r, r) self column exactly

    # Algebraic identity:
    #   sum_c mask_full*(shifted - log_denom)
    #     = sum(mask_nb * lp_b) - diag_m * self_shifted - sum_mask * log_denom
    numer = (jnp.sum(mask_nb * lp_b, axis=1, keepdims=True)
             - diag_m * self_shifted
             - sum_mask * log_denom)                                      # [tm, 1]

    safe_sum_mask = jnp.where(sum_mask == 0.0, 1.0, sum_mask)             # guard /0
    out_ref[...] = -(numer / safe_sum_mask)


def _pick_tm(n, b, requested=None):
    if requested is not None:
        assert n % requested == 0, "row tile must divide V*B"
        return requested
    # Prefer 128-row tiles: full MXU height on every TPU generation, half the [tm,N]
    # f32 intermediate footprint of tm=256 (matters on v5e regalloc / v7x 64 MiB VMEM),
    # and even grids more often for v7x dual-TensorCore 'parallel' sharding.
    candidates = [t for t in (128, 256, 64, 32, 16, 8) if n % t == 0]
    # Among valid tiles, prefer one that also divides B so the [B, B] mask can be
    # streamed directly (wrapping index_map) with no [N, B] materialization.
    for t in candidates:
        if t <= b and b % t == 0:
            return t
    if candidates:
        return candidates[0]
    return n  # single-tile fallback (block shape == full array shape)


def _vmem_capacity_bytes():
    try:
        cap = getattr(pltpu.get_tpu_info(), "vmem_capacity_bytes", None)
        if cap:
            return int(cap)
    except Exception:
        pass
    return 128 * 1024 * 1024  # v5e/v6e capacity if the query is unavailable


def unsup_bias_contrastive_loss(cont_features, cont_labels, cont_bias_feats,
                                temperature=0.07, tm=None,
                                feature_dtype=jnp.bfloat16):
    """Forward pass of UnsupBiasContrastiveLoss.

    cont_features:   [B, V, D] float
    cont_labels:     [B]       int
    cont_bias_feats: [B, Db]   float
    returns loss:    [V, B]    float32
    """
    B, V, D = cont_features.shape
    N = V * B
    tm = _pick_tm(N, B, tm)

    # --- glue (plain JAX, tiny O(B^2) work): mask construction ----------------
    # mask = label_eq * (1 - cosine_similarity(bias_feats)).  The diagonal is NOT
    # pre-zeroed: the (r, r) self column is excluded analytically in the kernel,
    # exactly like the reference logits_mask (degenerate unique-label rows behave
    # identically to the PyTorch code).
    bf = cont_bias_feats.astype(jnp.float32)
    bn = bf / jnp.maximum(jnp.linalg.norm(bf, axis=1, keepdims=True), 1e-12)
    label_eq = (cont_labels.reshape(-1, 1) == cont_labels.reshape(1, -1)).astype(jnp.float32)
    mask_bb = label_eq * (1.0 - bn @ bn.T)                          # [B, B]
    diag_bb = jnp.diagonal(mask_bb).reshape(B, 1)                   # [B, 1]

    # contrast_feature = cat(unbind(features, dim=1), dim=0) -> [V*B, D], bf16 for MXU
    contrast = jnp.transpose(cont_features, (1, 0, 2)).reshape(N, D).astype(feature_dtype)

    if tm <= B and B % tm == 0:
        # Stream the raw [B, B] mask; the index_map wraps over the view axis.
        nb = B // tm
        mask_arg, diag_arg = mask_bb, diag_bb
        if nb > 1:
            mask_map = lambda i: (i % nb, 0)
        else:
            mask_map = lambda i: (0, 0)        # constant block index -> no re-fetch
    else:
        # Fallback: anchor-tiled [N, B] mask (only when tm does not divide B).
        mask_arg = jnp.tile(mask_bb, (V, 1))
        diag_arg = jnp.tile(diag_bb, (V, 1))
        mask_map = lambda i: (i, 0)

    # --- VMEM budget / cost hints ----------------------------------------------
    fbytes = jnp.dtype(feature_dtype).itemsize
    vmem_est = (2 * N * D * fbytes            # resident contrast (double-buffer reservation)
                + 2 * tm * B * 4              # streamed mask tile
                + 4 * tm * 4                  # diag + output tiles
                + 5 * tm * N * 4)             # [tm,N] f32 intermediates (logits/shifted/exp)
    vmem_cap = _vmem_capacity_bytes()
    vmem_limit = int(min(int(0.8 * vmem_cap),           # v7x: 64 MiB/TC -> ~51 MiB cap
                         max(32 * 1024 * 1024, 2 * vmem_est)))
    # TODO(synk): for large N where the [N,D] contrast + [tm,N] intermediates no longer fit
    # (esp. v7x 64 MiB/TC), add a column-tiled online-LSE (flash-softmax) grid axis instead
    # of full-N residency, and single-buffer the resident contrast (pl.Buffered(1)) once
    # BlockSpec pipeline_mode is verified for top-level pallas_call on the target jax.

    cost = pl.CostEstimate(
        flops=int(2 * N * N * D),
        transcendentals=int(N * N + 2 * N),
        bytes_accessed=int(N * D * fbytes + mask_arg.size * 4 + diag_arg.size * 4 + N * 4),
    )

    kernel = functools.partial(_debias_supcon_kernel,
                               inv_temperature=float(1.0 / temperature))

    loss_col = pl.pallas_call(
        kernel,
        out_shape=jax.ShapeDtypeStruct((N, 1), jnp.float32),
        grid_spec=pltpu.PrefetchScalarGridSpec(
            num_scalar_prefetch=0,
            grid=(N // tm,),
            in_specs=[
                pl.BlockSpec((N, D), lambda i: (0, 0)),    # full contrast matrix, resident
                pl.BlockSpec((tm, B), mask_map),           # per-batch mask rows
                pl.BlockSpec((tm, 1), mask_map),           # self-column mask value
            ],
            out_specs=pl.BlockSpec((tm, 1), lambda i: (i, 0)),
        ),
        compiler_params=pltpu.CompilerParams(
            dimension_semantics=("parallel",),
            vmem_limit_bytes=vmem_limit),
        cost_estimate=cost,
    )(contrast, mask_arg, diag_arg)

    # loss.view(anchor_count, batch_size)
    return loss_col.reshape(V, B)


def _reference_jax(cont_features, cont_labels, cont_bias_feats, temperature=0.07,
                   feature_dtype=jnp.float32):
    """Pure-JAX reference mirroring the PyTorch code (for sanity checking)."""
    B, V, D = cont_features.shape
    N = V * B
    bf = cont_bias_feats.astype(jnp.float32)
    bn = bf / jnp.maximum(jnp.linalg.norm(bf, axis=1, keepdims=True), 1e-12)
    mask = 1.0 - bn @ bn.T
    labels = cont_labels.reshape(-1, 1)
    mask = (labels == labels.T).astype(jnp.float32) * mask
    contrast = (jnp.transpose(cont_features, (1, 0, 2)).reshape(N, D)
                .astype(feature_dtype).astype(jnp.float32))
    adc = (contrast @ contrast.T) / temperature
    logits = adc - jnp.max(adc, axis=1, keepdims=True)
    mask = jnp.tile(mask, (V, V))
    logits_mask = 1.0 - jnp.eye(N, dtype=jnp.float32)
    mask = mask * logits_mask
    exp_logits = jnp.exp(logits) * logits_mask
    log_prob = logits - jnp.log(jnp.sum(exp_logits, axis=1, keepdims=True) + 1e-9)
    sum_mask = jnp.sum(mask, axis=1)
    sum_mask = jnp.where(sum_mask == 0.0, 1.0, sum_mask)
    mean_log_prob_pos = jnp.sum(mask * log_prob, axis=1) / sum_mask
    return (-mean_log_prob_pos).reshape(V, B)


if __name__ == "__main__":
    # Deterministic example: batch=128, views=2, feat_dim=128, bias_dim=32
    # -> N = 256, tm = 128, grid = 2 (exercises the tiled path + view folding).
    key = jax.random.PRNGKey(0)
    k1, k2, k3 = jax.random.split(key, 3)
    B, V, D, Db = 128, 2, 128, 32

    feats = jax.random.normal(k1, (B, V, D), dtype=jnp.float32)
    # SupCon features are typically L2-normalized per view.
    feats = feats / jnp.linalg.norm(feats, axis=-1, keepdims=True)
    labels = jax.random.randint(k2, (B,), 0, 4)
    bias_feats = jax.random.normal(k3, (B, Db), dtype=jnp.float32)

    loss = unsup_bias_contrastive_loss(feats, labels, bias_feats, temperature=0.07)
    loss = jax.block_until_ready(loss)
    assert loss.shape == (V, B)

    # Tight check against a reference that uses the same bf16 feature rounding.
    ref_bf16 = _reference_jax(feats, labels, bias_feats, 0.07, feature_dtype=jnp.bfloat16)
    assert jnp.allclose(loss, ref_bf16, atol=5e-3, rtol=5e-3), (
        float(jnp.max(jnp.abs(loss - ref_bf16))))

    # Loose sanity check against the pure-f32 reference (bf16 MXU drift expected).
    ref_f32 = _reference_jax(feats, labels, bias_feats, 0.07, feature_dtype=jnp.float32)
    assert jnp.allclose(loss, ref_f32, atol=6e-2, rtol=6e-2), (
        float(jnp.max(jnp.abs(loss - ref_f32))))

    # Second config: explicit tm=64 exercises the wrapping mask index_map (B // tm = 2)
    # and a 4-step grid with the same inputs.
    loss64 = unsup_bias_contrastive_loss(feats, labels, bias_feats, temperature=0.07, tm=64)
    loss64 = jax.block_until_ready(loss64)
    assert jnp.allclose(loss64, ref_bf16, atol=5e-3, rtol=5e-3), (
        float(jnp.max(jnp.abs(loss64 - ref_bf16))))

    print("KERNEL_OK")
</pallas_src>

<mosaic_0001>
module attributes {stable_mosaic.version = 11 : i64} {
  func.func @_debias_supcon_kernel(%arg0: i32, %arg1: memref<256x128xbf16, #tpu.memory_space<vmem>>, %arg2: memref<128x128xf32, #tpu.memory_space<vmem>>, %arg3: memref<128x1xf32, #tpu.memory_space<vmem>>, %arg4: memref<128x1xf32, #tpu.memory_space<vmem>>) attributes {dimension_semantics = [#tpu.dimension_semantics<parallel>], iteration_bounds = array<i64: 2>, scalar_prefetch = 0 : i64, scratch_operands = 0 : i64, tpu.core_type = #tpu.core_type<tc>, window_params = [{pipeline_mode = #tpu.pipeline_mode<synchronous>, transform_indices = @transform_0, window_bounds = array<i64: 256, 128>}, {pipeline_mode = #tpu.pipeline_mode<synchronous>, transform_indices = @transform_1, window_bounds = array<i64: 128, 128>}, {pipeline_mode = #tpu.pipeline_mode<synchronous>, transform_indices = @transform_2, window_bounds = array<i64: 128, 1>}, {transform_indices = @transform_3, window_bounds = array<i64: 128, 1>}]} {
    %c128_i32 = arith.constant 128 : i32
    %0 = arith.muli %arg0, %c128_i32 : i32
    %1 = tpu.assume_multiple %0, 128 : i32
    %2 = arith.index_cast %1 : i32 to index
    %c0 = arith.constant 0 : index
    %3 = vector.load %arg1[%2, %c0] : memref<256x128xbf16, #tpu.memory_space<vmem>>, vector<128x128xbf16>
    %c0_0 = arith.constant 0 : index
    %c0_1 = arith.constant 0 : index
    %4 = vector.load %arg1[%c0_0, %c0_1] : memref<256x128xbf16, #tpu.memory_space<vmem>>, vector<256x128xbf16>
    %cst = arith.constant dense<0.000000e+00> : vector<128x256xf32>
    %5 = tpu.matmul %3, %4, %cst {dimension_numbers = #tpu.dot_dimension_numbers<[1], [1], [0], [0], [0, 0, 1, 0], [], []>} : vector<128x128xbf16>, vector<256x128xbf16>, vector<128x256xf32> -> vector<128x256xf32>
    %cst_2 = arith.constant 14.2857141 : f32
    %6 = vector.broadcast %cst_2 : f32 to vector<128x256xf32>
    %7 = arith.mulf %5, %6 : vector<128x256xf32>
    %cst_3 = arith.constant dense<0xFF800000> : vector<128xf32>
    %8 = vector.multi_reduction <maximumf>, %7, %cst_3 [1] : vector<128x256xf32> to vector<128xf32>
    %9 = vector.shape_cast %8 : vector<128xf32> to vector<128x1xf32>
    %10 = vector.broadcast %9 : vector<128x1xf32> to vector<128x256xf32>
    %11 = arith.subf %7, %10 : vector<128x256xf32>
    %12 = arith.extf %3 : vector<128x128xbf16> to vector<128x128xf32>
    %13 = arith.mulf %12, %12 : vector<128x128xf32>
    %cst_4 = arith.constant dense<0.000000e+00> : vector<128xf32>
    %14 = vector.multi_reduction <add>, %13, %cst_4 [1] : vector<128x128xf32> to vector<128xf32>
    %15 = vector.shape_cast %14 : vector<128xf32> to vector<128x1xf32>
    %cst_5 = arith.constant 14.2857141 : f32
    %16 = vector.broadcast %cst_5 : f32 to vector<128x1xf32>
    %17 = arith.mulf %16, %15 : vector<128x1xf32>
    %18 = arith.subf %17, %9 : vector<128x1xf32>
    %19 = math.exp %11 : vector<128x256xf32>
    %cst_6 = arith.constant dense<0.000000e+00> : vector<128xf32>
    %20 = vector.multi_reduction <add>, %19, %cst_6 [1] : vector<128x256xf32> to vector<128xf32>
    %21 = vector.shape_cast %20 : vector<128xf32> to vector<128x1xf32>
    %22 = math.exp %18 : vector<128x1xf32>
    %23 = arith.subf %21, %22 : vector<128x1xf32>
    %cst_7 = arith.constant 0.000000e+00 : f32
    %24 = vector.broadcast %cst_7 : f32 to vector<128x1xf32>
    %25 = arith.maximumf %23, %24 : vector<128x1xf32>
    %cst_8 = arith.constant 9.99999971E-10 : f32
    %26 = vector.broadcast %cst_8 : f32 to vector<128x1xf32>
    %27 = arith.addf %25, %26 : vector<128x1xf32>
    %28 = math.log %27 : vector<128x1xf32>
    %29 = vector.extract_strided_slice %11 {offsets = [0, 0], sizes = [128, 128], strides = [1, 1]} : vector<128x256xf32> to vector<128x128xf32>
    %30 = vector.extract_strided_slice %11 {offsets = [0, 128], sizes = [128, 128], strides = [1, 1]} : vector<128x256xf32> to vector<128x128xf32>
    %31 = arith.addf %29, %30 : vector<128x128xf32>
    %c0_9 = arith.constant 0 : index
    %c0_10 = arith.constant 0 : index
    %32 = vector.load %arg2[%c0_9, %c0_10] : memref<128x128xf32, #tpu.memory_space<vmem>>, vector<128x128xf32>
    %c0_11 = arith.constant 0 : index
    %c0_12 = arith.constant 0 : index
    %33 = vector.load %arg3[%c0_11, %c0_12] : memref<128x1xf32, #tpu.memory_space<vmem>>, vector<128x1xf32>
    %cst_13 = arith.constant dense<0.000000e+00> : vector<128xf32>
    %34 = vector.multi_reduction <add>, %32, %cst_13 [1] : vector<128x128xf32> to vector<128xf32>
    %35 = vector.shape_cast %34 : vector<128xf32> to vector<128x1xf32>
    %cst_14 = arith.constant 2.000000e+00 : f32
    %36 = vector.broadcast %cst_14 : f32 to vector<128x1xf32>
    %37 = arith.mulf %36, %35 : vector<128x1xf32>
    %38 = arith.subf %37, %33 : vector<128x1xf32>
    %39 = arith.mulf %32, %31 : vector<128x128xf32>
    %cst_15 = arith.constant dense<0.000000e+00> : vector<128xf32>
    %40 = vector.multi_reduction <add>, %39, %cst_15 [1] : vector<128x128xf32> to vector<128xf32>
    %41 = vector.shape_cast %40 : vector<128xf32> to vector<128x1xf32>
    %42 = arith.mulf %33, %18 : vector<128x1xf32>
    %43 = arith.subf %41, %42 : vector<128x1xf32>
    %44 = arith.mulf %38, %28 : vector<128x1xf32>
    %45 = arith.subf %43, %44 : vector<128x1xf32>
    %cst_16 = arith.constant 0.000000e+00 : f32
    %46 = vector.broadcast %cst_16 : f32 to vector<128x1xf32>
    %47 = arith.cmpf oeq, %38, %46 : vector<128x1xf32>
    %cst_17 = arith.constant 1.000000e+00 : f32
    %48 = vector.broadcast %cst_17 : f32 to vector<128x1xf32>
    %49 = arith.select %47, %48, %38 : vector<128x1xi1>, vector<128x1xf32>
    %50 = arith.divf %45, %49 : vector<128x1xf32>
    %cst_18 = arith.constant 0.000000e+00 : f32
    %51 = vector.broadcast %cst_18 : f32 to vector<128x1xf32>
    %52 = arith.subf %51, %50 : vector<128x1xf32>
    %c0_19 = arith.constant 0 : index
    %c0_20 = arith.constant 0 : index
    %53 = vector.load %arg4[%c0_19, %c0_20] : memref<128x1xf32, #tpu.memory_space<vmem>>, vector<128x1xf32>
    tpu.vector_store %arg4[%c0_19, %c0_20], %52 {strides = array<i32>} : memref<128x1xf32, #tpu.memory_space<vmem>>, vector<128x1xf32>,
    return
  }
  func.func @transform_0(%arg0: i32) -> (i32, i32) {
    %c0_i32 = arith.constant 0 : i32
    %c0_i32_0 = arith.constant 0 : i32
    %c0_i32_1 = arith.constant 0 : i32
    return %c0_i32, %c0_i32_0 : i32, i32
  }
  func.func @transform_1(%arg0: i32) -> (i32, i32) {
    %c0_i32 = arith.constant 0 : i32
    %c0_i32_0 = arith.constant 0 : i32
    %c0_i32_1 = arith.constant 0 : i32
    return %c0_i32, %c0_i32_0 : i32, i32
  }
  func.func @transform_2(%arg0: i32) -> (i32, i32) {
    %c0_i32 = arith.constant 0 : i32
    %c0_i32_0 = arith.constant 0 : i32
    %c0_i32_1 = arith.constant 0 : i32
    return %c0_i32, %c0_i32_0 : i32, i32
  }
  func.func @transform_3(%arg0: i32) -> (i32, i32) {
    %c0_i32 = arith.constant 0 : i32
    %c0_i32_0 = arith.constant 0 : i32
    return %arg0, %c0_i32 : i32, i32
  }
}

</mosaic_0001>

<bundles_post_ra>
// kernel: tpu_custom_call.1
= control target key start
LH: loop header
LB: loop body
LE: loop exit
PB: predicated region body
PF: predicated region fallthrough
CT: control target
= control target key end

     0   :  { %8 = vsyncpa [#allocation3], 0  ;;  %s1647_s12 = smov 0   ;;  %s2599_s0 = inlined_call_operand.vmem [shape: bf16[256,128], index: 0, kind: input, shape index: {}]   ;;  %s2600_s1 = inlined_call_operand.hbm [shape: f32[128,128], index: 1, kind: input, shape index: {}]   ;;  %s2601_s2 = inlined_call_operand.vmem [shape: f32[128,1], index: 2, kind: input, shape index: {}]   ;;  %s2602_s3 = inlined_call_operand.vmem [shape: f32[256,1], index: 3, kind: output, shape index: {}]  }
   0x1 LB: > { %s1653_s13 = sadd.s32 4294967295, %s1622_s12   ;;  %p1291_p0 = scmp.ge.s32.totalorder %s1622_s12, 1  ;;  %s1622_s12 = sphi %s1647_s12, %s14_s12  }
   0x2   : > { %p108_p1 = scmp.lt.s32.totalorder %s1622_s12, 3  ;;  %s1624_s14 = smov [#allocation2]  }
   0x3   : > { %s123_s15 = sshll.u32 %s1624_s14, 4  ;;  %p1381_p3 = scmp.eq.s32.totalorder %s1653_s13, 0  ;;  %s124_s15 = int_to_ptr.vmem [resolvable:$true] %s123_s15 }
   0x4   : > { %p1657_p2 = pnand %p1291_p0, %p108_p1  ;;  %s1597_s17 = scalar_lea.vmem %s124_s15, 2048 }
   0x5   : > { %p1598_p7 = scmp.ne.s32.totalorder %s124_s15, %s1597_s17  ;;  %p1605_p10 = scmp.lt.s32.totalorder %s124_s15, %s124_s15 }
   0x6   : > { %p1377_p4 = pneg %p1657_p2  ;;  %p1606_p11 = scmp.lt.s32.totalorder %s1597_s17, %s1597_s17 }
   0x8   : > { %p1378_p5 = pnand %p1381_p3, %p1377_p4  ;;  %p1607_p12 = por %p1606_p11, %p1605_p10 }
   0xa   : > { %p1588_p6 = pneg %p1378_p5 }
   0xc   : > { %p1600_p8 = pnand %p1598_p7, %p1588_p6 }
   0xe   : > { %p1601_p9 = pneg %p1600_p8 }
  0x10   : > { %p1608_p13 = pnand %p1607_p12, %p1601_p9 }
  0x12   : > { %1611 = shalt.err (!%p1608_p13)
}
  0x13   : > { %s1625_s18 = smov 128   ;;  %s1626_s19 = smov 8  }
  0x14   : > { %1380 = dma.hbm_to_vmem [thread:$0]  (!%p1378_p5), %s2600_s1, 2048, %s124_s15, [#allocation3], %s1625_s18, %s1625_s18, %s1626_s19  }
  0x15   : > { %142 = sbr.rel (%p1657_p2) target bundleno = 657 (0x291), region = 32 }
  0x1a   : > { %1617 = dma.done.wait (%p1381_p3), [#allocation3], 2048  }
  0x1b   : > { %1619 = vsyncadd (%p1381_p3), [#allocation3], 4294965248  ;;  %v1394_v0 = vld [vmem:[%s2599_s0 + $0x78] sm:$0xff]   ;;  %v1396_v2 = vld [vmem:[%s2599_s0 + $0x70] sm:$0xff]   ;;  %s1297_s28 = sshll.u32 %s1653_s13, 7  ;;  %s1295_s5 = sshll.u32 %s1653_s13, 4 }
  0x1c   : > { %v1395_v1 = vld [vmem:[%s2599_s0 + $0x38] sm:$0xff]   ;;  %1325 = vmatprep.subr.bf16.mxu0 %v1394_v0  ;;  %1357 = vmatprep.subr.bf16.mxu1 %v1394_v0  ;;  %v1397_v3 = vld [vmem:[%s2599_s0 + $0x30] sm:$0xff]   ;;  %s169_s4 = sshra.s32 %s1297_s28, 3  ;;  %v1398_v4 = vld [vmem:[%s2599_s0 + $0x68] sm:$0xff]   ;;  %p2387_p0 = scmp.lt.s32.totalorder %s1295_s5, 31  ;;  %vm1214_vm11 = vcmask 7168  }
  0x1d   : > { %1326 = vmatpush3.bf16.xpose.msra.mxu0 %v1395_v1  ;;  %1365 = vmatpush3.bf16.xpose.msra.mxu1 %v1395_v1  ;;  %s1298_s7 = sshll.u32 %s169_s4, 2  ;;  %v1399_v5 = vld [vmem:[%s2599_s0 + $0x28] sm:$0xff]   ;;  %v1400_v6 = vld [vmem:[%s2599_s0 + $0x60] sm:$0xff]   ;;  %v1402_v21 = vld [vmem:[%s2599_s0 + $0x58] sm:$0xff]  }
  0x1e   : > { %1327 = vmatprep.subr.bf16.mxu0 %v1396_v2  ;;  %1358 = vmatprep.subr.bf16.mxu1 %v1396_v2  ;;  %s1694_s10 = scalar_lea.vmem %s2599_s0, %s1298_s7  ;;  %v1401_v20 = vld [vmem:[%s2599_s0 + $0x20] sm:$0xff]   ;;  %v1403_v23 = vld [vmem:[%s2599_s0 + $0x18] sm:$0xff]   ;;  %v1404_v24 = vld [vmem:[%s2599_s0 + $0x50] sm:$0xff]   ;;  %s2647_s5 = smov (!%p2387_p0, %s1295_s5), 31 }
  0x1f   : > { %v173_v7 = vld [vmem:[%s1694_s10] sm:$0xff]   ;;  %v175_v10 = vld [vmem:[%s1694_s10 + $0x8] sm:$0xff]   ;;  %v177_v16 = vld [vmem:[%s1694_s10 + $0x10] sm:$0xff]   ;;  %s1296_s13 = sshll.u32 %s2647_s5, 3 }
  0x20   : > { %v1704_v8 = vld [vmem:[%s1694_s10 + $0x20] sm:$0xff]   ;;  %v590_v9 = vunpack.c.l.bf16 %v173_v7  ;;  %v591_v11 = vunpack.c.h.bf16 %v173_v7  ;;  %v592_v13 = vunpack.c.l.bf16 %v175_v10  ;;  %v593_v15 = vunpack.c.h.bf16 %v175_v10  ;;  %1341 = vmatprep.mubr.bf16.mxu0 %v173_v7  ;;  %v1405_v25 = vld [vmem:[%s2599_s0 + $0x10] sm:$0xff]   ;;  %v1406_v26 = vld [vmem:[%s2599_s0 + $0x48] sm:$0xff]   ;;  %s2454_s15 = scalar_lea.vmem %s2602_s3, %s1296_s13 }
  0x21   : > { %1349 = vmatprep.mubr.bf16.mxu1 %v1704_v8  ;;  %v594_v19 = vunpack.c.l.bf16 %v177_v16  ;;  %v1407_v27 = vld [vmem:[%s2599_s0 + $0x8] sm:$0xff]   ;;  %v1408_v28 = vld [vmem:[%s2599_s0 + $0x40] sm:$0xff]   ;;  %v1742_v31 = vld [vmem:[%s1694_s10 + $0x30] sm:$0xff]   ;;  %v595_v34 = vunpack.c.h.bf16 %v177_v16 }
  0x22   : > { %v606_v12 = vmul.f32 %v590_v9, %v590_v9  ;;  %v607_v14 = vmul.f32 %v591_v11, %v591_v11  ;;  %v608_v17 = vmul.f32 %v592_v13, %v592_v13  ;;  %v609_v18 = vmul.f32 %v593_v15, %v593_v15  ;;  %v1409_v29 = vld [vmem:[%s2599_s0] sm:$0xff]   ;;  %v1737_v30 = vld [vmem:[%s1694_s10 + $0x28] sm:$0xff]   ;;  %v179_v32 = vld [vmem:[%s1694_s10 + $0x18] sm:$0xff]  }
  0x23   : > { %v610_v22 = vmul.f32 %v594_v19, %v594_v19  ;;  %v1748_v33 = vld [vmem:[%s1694_s10 + $0x38] sm:$0xff]   ;;  %v596_v35 = vunpack.c.l.bf16 %v179_v32  ;;  %v611_v36 = vmul.f32 %v595_v34, %v595_v34  ;;  %v597_v38 = vunpack.c.h.bf16 %v179_v32 }
  0x24   : > { %622 = vadd.xlane.f32.xlu0 %v606_v12  ;;  %624 = vadd.xlane.f32.xlu1 %v607_v14 }
  0x25   : > { %1328 = vmatpush3.bf16.xpose.msra.mxu0 %v1397_v3  ;;  %1366 = vmatpush3.bf16.xpose.msra.mxu1 %v1397_v3  ;;  %v612_v37 = vmul.f32 %v596_v35, %v596_v35  ;;  %v613_v39 = vmul.f32 %v597_v38, %v597_v38 }
  0x26   : > { %1329 = vmatprep.subr.bf16.mxu0 %v1398_v4  ;;  %1359 = vmatprep.subr.bf16.mxu1 %v1398_v4 }
  0x28   : > { %626 = vadd.xlane.f32.xlu0 %v608_v17  ;;  %628 = vadd.xlane.f32.xlu1 %v609_v18 }
  0x2c   : > { %630 = vadd.xlane.f32.xlu0 %v610_v22  ;;  %632 = vadd.xlane.f32.xlu1 %v611_v36 }
  0x2d   : > { %1330 = vmatpush3.bf16.xpose.msra.mxu0 %v1399_v5  ;;  %1367 = vmatpush3.bf16.xpose.msra.mxu1 %v1399_v5 }
  0x2e   : > { %1331 = vmatprep.subr.bf16.mxu0 %v1400_v6  ;;  %1360 = vmatprep.subr.bf16.mxu1 %v1400_v6 }
  0x30   : > { %634 = vadd.xlane.f32.xlu0 %v612_v37  ;;  %636 = vadd.xlane.f32.xlu1 %v613_v39 }
  0x35   : > { %1332 = vmatpush3.bf16.xpose.msra.mxu0 %v1401_v20  ;;  %1368 = vmatpush3.bf16.xpose.msra.mxu1 %v1401_v20 }
  0x36   : > { %1333 = vmatprep.subr.bf16.mxu0 %v1402_v21  ;;  %1361 = vmatprep.subr.bf16.mxu1 %v1402_v21 }
  0x3d   : > { %1334 = vmatpush3.bf16.xpose.msra.mxu0 %v1403_v23  ;;  %1369 = vmatpush3.bf16.xpose.msra.mxu1 %v1403_v23 }
  0x3e   : > { %1335 = vmatprep.subr.bf16.mxu0 %v1404_v24  ;;  %1362 = vmatprep.subr.bf16.mxu1 %v1404_v24 }
  0x45   : > { %1336 = vmatpush3.bf16.xpose.msra.mxu0 %v1405_v25  ;;  %1370 = vmatpush3.bf16.xpose.msra.mxu1 %v1405_v25 }
  0x46   : > { %1337 = vmatprep.subr.bf16.mxu0 %v1406_v26  ;;  %1363 = vmatprep.subr.bf16.mxu1 %v1406_v26 }
  0x4d   : > { %1338 = vmatpush3.bf16.xpose.msra.mxu0 %v1407_v27  ;;  %1371 = vmatpush3.bf16.xpose.msra.mxu1 %v1407_v27 }
  0x4e   : > { %1339 = vmatprep.subr.bf16.mxu0 %v1408_v28  ;;  %1364 = vmatprep.subr.bf16.mxu1 %v1408_v28 }
  0x55   : > { %1340 = vmatpush3.bf16.xpose.msra.mxu0 %v1409_v29  ;;  %1372 = vmatpush3.bf16.xpose.msra.mxu1 %v1409_v29 }
  0x5c   : > { %1342 = vmatmul.mubr.bf16.vlgmr.msra.gmra.mxu0 %v173_v7  ;;  %1350 = vmatmul.mubr.bf16.vlgmr.msra.gmra.mxu1 %v1704_v8 }
  0x5d   : > { %1343 = vmatprep.mubr.bf16.mxu0 %v175_v10  ;;  %1351 = vmatprep.mubr.bf16.mxu1 %v1737_v30 }
  0x64   : > { %1344 = vmatmul.mubr.bf16.gmra.mxu0 %v175_v10  ;;  %1352 = vmatmul.mubr.bf16.gmra.mxu1 %v1737_v30 }
  0x65   : > { %1345 = vmatprep.mubr.bf16.mxu0 %v177_v16  ;;  %1353 = vmatprep.mubr.bf16.mxu1 %v1742_v31 }
  0x6c   : > { %1346 = vmatmul.mubr.bf16.gmra.mxu0 %v177_v16  ;;  %1354 = vmatmul.mubr.bf16.gmra.mxu1 %v1742_v31 }
  0x6d   : > { %1347 = vmatprep.mubr.bf16.mxu0 %v179_v32  ;;  %1355 = vmatprep.mubr.bf16.mxu1 %v1748_v33 }
  0x74   : > { %1348 = vmatmul.mubr.bf16.gmra.mxu0 %v179_v32  ;;  %1356 = vmatmul.mubr.bf16.gmra.mxu1 %v1748_v33 }
 0x11c   : > { %v399_v40 = vpop.f32.mrf.mxu0  ;;  %v439_v41 = vpop.f32.mrf.mxu1 }
 0x11d   : > { %v1753_v44 = vmul.f32 14.285714, %v399_v40  ;;  %v1757_v48 = vmul.f32 14.285714, %v439_v41 }
 0x11e   : > { %v401_v42 = vpop.f32.mrf.mxu0  ;;  %v441_v43 = vpop.f32.mrf.mxu1 }
 0x11f   : > { %v1755_v45 = vmul.f32 14.285714, %v401_v42  ;;  %v1759_v49 = vmul.f32 14.285714, %v441_v43 }
 0x120   : > { %v403_v46 = vpop.f32.mrf.mxu0  ;;  %v443_v47 = vpop.f32.mrf.mxu1 }
 0x121   : > { %v510_v50 = vmax.f32 %v1753_v44, %v1755_v45  ;;  %v1763_v53 = vmul.f32 14.285714, %v443_v47  ;;  %v534_v60 = vmax.f32 %v1757_v48, %v1759_v49  ;;  %v1775_v61 = vmul.f32 14.285714, %v403_v46 }
 0x122   : > { %v405_v51 = vpop.f32.mrf.mxu0  ;;  %v445_v52 = vpop.f32.mrf.mxu1 }
 0x123   : > { %v1765_v54 = vmul.f32 14.285714, %v445_v52  ;;  %511 = vmax.xlane.f32.xlu0 %v510_v50  ;;  %v1767_v57 = vmul.f32 14.285714, %v405_v51 }
 0x124   : > { %v409_v55 = vpop.f32.mrf.mxu0  ;;  %v449_v56 = vpop.f32.mrf.mxu1 }
 0x125   : > { %v1769_v58 = vmul.f32 14.285714, %v409_v55  ;;  %v537_v59 = vmax.f32 %v1763_v53, %v1765_v54  ;;  %v1779_v1 = vmul.f32 14.285714, %v449_v56  ;;  %v513_v5 = vmax.f32 %v1775_v61, %v1767_v57 }
 0x126   : > { %v411_v62 = vpop.f32.mrf.mxu0  ;;  %v451_v63 = vpop.f32.mrf.mxu1 }
 0x127   : > { %v1777_v0 = vmul.f32 14.285714, %v411_v62  ;;  %538 = vmax.xlane.f32.xlu1 %v537_v59  ;;  %535 = vmax.xlane.f32.xlu0 %v534_v60  ;;  %v1781_v2 = vmul.f32 14.285714, %v451_v63 }
 0x128   : > { %v413_v3 = vpop.f32.mrf.mxu0  ;;  %v453_v4 = vpop.f32.mrf.mxu1 }
 0x129   : > { %v516_v6 = vmax.f32 %v1769_v58, %v1777_v0  ;;  %v1787_v10 = vmul.f32 14.285714, %v413_v3  ;;  %v540_v12 = vmax.f32 %v1779_v1, %v1781_v2  ;;  %v1793_v15 = vmul.f32 14.285714, %v453_v4 }
 0x12a   : > { %v415_v7 = vpop.f32.mrf.mxu0  ;;  %v455_v9 = vpop.f32.mrf.mxu1  ;;  %v598_v4 = vunpack.c.l.bf16 %v1704_v8 }
 0x12b   : > { %v1789_v11 = vmul.f32 14.285714, %v415_v7  ;;  %514 = vmax.xlane.f32.xlu0 %v513_v5  ;;  %517 = vmax.xlane.f32.xlu1 %v516_v6  ;;  %v1797_v17 = vmul.f32 14.285714, %v455_v9 }
 0x12c   : > { %v419_v13 = vpop.f32.mrf.mxu0  ;;  %v459_v14 = vpop.f32.mrf.mxu1  ;;  %v614_v9 = vmul.f32 %v598_v4, %v598_v4  ;;  %v1895_v4 = vld [vmem:[#allocation2 + $0x68] sm:$0xff] }
 0x12d   : > { %v1795_v16 = vmul.f32 14.285714, %v419_v13  ;;  %v519_v18 = vmax.f32 %v1787_v10, %v1789_v11  ;;  %v1803_v22 = vmul.f32 14.285714, %v459_v14  ;;  %v543_v26 = vmax.f32 %v1793_v15, %v1797_v17 }
 0x12e   : > { %v421_v19 = vpop.f32.mrf.mxu0  ;;  %v461_v20 = vpop.f32.mrf.mxu1  ;;  %v599_v13 = vunpack.c.h.bf16 %v1704_v8 }
 0x12f   : > { %v1801_v21 = vmul.f32 14.285714, %v421_v19  ;;  %541 = vmax.xlane.f32.xlu0 %v540_v12  ;;  %520 = vmax.xlane.f32.xlu1 %v519_v18  ;;  %v1805_v23 = vmul.f32 14.285714, %v461_v20  ;;  %v600_v12 = vunpack.c.l.bf16 %v1737_v30  ;;  %v602_v20 = vunpack.c.l.bf16 %v1742_v31 }
 0x130   : > { %v423_v24 = vpop.f32.mrf.mxu0  ;;  %v463_v25 = vpop.f32.mrf.mxu1  ;;  %v615_v19 = vmul.f32 %v599_v13, %v599_v13 }
 0x131   : > { %v522_v27 = vmax.f32 %v1795_v16, %v1801_v21  ;;  %v1811_v32 = vmul.f32 14.285714, %v423_v24  ;;  %v546_v35 = vmax.f32 %v1803_v22, %v1805_v23  ;;  %v1817_v38 = vmul.f32 14.285714, %v463_v25 }
 0x132   : > { %v425_v28 = vpop.f32.mrf.mxu0  ;;  %v465_v29 = vpop.f32.mrf.mxu1  ;;  %v616_v18 = vmul.f32 %v600_v12, %v600_v12  ;;  %v601_v24 = vunpack.c.h.bf16 %v1737_v30  ;;  %v618_v25 = vmul.f32 %v602_v20, %v602_v20  ;;  %v1857_v30 = vld [vmem:[#allocation2 + $0x10] sm:$0xff] }
 0x133   : > { %v1813_v34 = vmul.f32 14.285714, %v425_v28  ;;  %544 = vmax.xlane.f32.xlu1 %v543_v26  ;;  %523 = vmax.xlane.f32.xlu0 %v522_v27  ;;  %v1821_v40 = vmul.f32 14.285714, %v465_v29  ;;  %v604_v27 = vunpack.c.l.bf16 %v1748_v33  ;;  %v603_v28 = vunpack.c.h.bf16 %v1742_v31  ;;  %v1863_v31 = vld [vmem:[#allocation2 + $0x20] sm:$0xff]  ;;  %v625_v12 = vpop.xlane.xlu1 %624 }
 0x134   : > { %v429_v36 = vpop.f32.mrf.mxu0  ;;  %v469_v37 = vpop.f32.mrf.mxu1  ;;  %v617_v26 = vmul.f32 %v601_v24, %v601_v24 }
 0x135   : > { %v1819_v39 = vmul.f32 14.285714, %v429_v36  ;;  %v525_v41 = vmax.f32 %v1811_v32, %v1813_v34  ;;  %v1827_v47 = vmul.f32 14.285714, %v469_v37  ;;  %v549_v55 = vmax.f32 %v1817_v38, %v1821_v40  ;;  %v926_v37 = vld [vmem:[#allocation2] sm:$0xff] }
 0x136   : > { %v431_v42 = vpop.f32.mrf.mxu0  ;;  %v471_v43 = vpop.f32.mrf.mxu1  ;;  %v620_v8 = vmul.f32 %v604_v27, %v604_v27  ;;  %v619_v29 = vmul.f32 %v603_v28, %v603_v28 }
 0x137   : > { %v1825_v46 = vmul.f32 14.285714, %v431_v42  ;;  %547 = vmax.xlane.f32.xlu0 %v546_v35  ;;  %526 = vmax.xlane.f32.xlu1 %v525_v41  ;;  %v1829_v50 = vmul.f32 14.285714, %v471_v43  ;;  %v605_v35 = vunpack.c.h.bf16 %v1748_v33  ;;  %v1859_v41 = vld [vmem:[#allocation2 + $0x8] sm:$0xff]  ;;  %v1865_v42 = vld [vmem:[#allocation2 + $0x18] sm:$0xff] }
 0x138   : > { %v433_v51 = vpop.f32.mrf.mxu0  ;;  %v473_v52 = vpop.f32.mrf.mxu1  ;;  %v1869_v33 = vld [vmem:[#allocation2 + $0x30] sm:$0xff]  ;;  %v1871_v43 = vld [vmem:[#allocation2 + $0x28] sm:$0xff] }
 0x139   : > { %v528_v56 = vmax.f32 %v1819_v39, %v1825_v46  ;;  %v1835_v62 = vmul.f32 14.285714, %v433_v51  ;;  %v552_v3 = vmax.f32 %v1827_v47, %v1829_v50  ;;  %v1842_v5 = vmul.f32 14.285714, %v473_v52  ;;  %v1875_v51 = vld [vmem:[#allocation2 + $0x40] sm:$0xff]  ;;  %v1877_v52 = vld [vmem:[#allocation2 + $0x38] sm:$0xff] }
 0x13a   : > { %v435_v59 = vpop.f32.mrf.mxu0  ;;  %v475_v60 = vpop.f32.mrf.mxu1  ;;  %v621_v36 = vmul.f32 %v605_v35, %v605_v35 }
 0x13b   : > { %v1837_v63 = vmul.f32 14.285714, %v435_v59  ;;  %550 = vmax.xlane.f32.xlu1 %v549_v55  ;;  %529 = vmax.xlane.f32.xlu0 %v528_v56  ;;  %v1844_v6 = vmul.f32 14.285714, %v475_v60  ;;  %v1881_v55 = vld [vmem:[#allocation2 + $0x50] sm:$0xff]  ;;  %v1883_v56 = vld [vmem:[#allocation2 + $0x48] sm:$0xff] }
 0x13c   : > { %v1887_v59 = vld [vmem:[#allocation2 + $0x60] sm:$0xff]  ;;  %v1889_v60 = vld [vmem:[#allocation2 + $0x58] sm:$0xff] }
 0x13d   : > { %v531_v7 = vmax.f32 %v1835_v62, %v1837_v63  ;;  %v555_v14 = vmax.f32 %v1842_v5, %v1844_v6 }
 0x13f   : > { %553 = vmax.xlane.f32.xlu0 %v552_v3  ;;  %532 = vmax.xlane.f32.xlu1 %v531_v7  ;;  %v1893_v3 = vld [vmem:[#allocation2 + $0x70] sm:$0xff]  ;;  %v1899_v7 = vld [vmem:[#allocation2 + $0x78] sm:$0xff] }
 0x143   : > { %638 = vadd.xlane.f32.xlu0 %v614_v9  ;;  %556 = vmax.xlane.f32.xlu1 %v555_v14  ;;  %v623_v9 = vpop.xlane.xlu0 %622  ;;  %v1902_v14 = vpop.xlane.xlu1 %628 }
 0x144   : > { %2615 = vst [vmem:[#allocation5_spill] sm:$0xff] %v1902_v14 }
 0x147   : > { %642 = vadd.xlane.f32.xlu0 %v616_v18  ;;  %640 = vadd.xlane.f32.xlu1 %v615_v19  ;;  %v627_v13 = vpop.xlane.xlu0 %626  ;;  %v1906_v19 = vpop.xlane.xlu1 %632 }
 0x14b   : > { %646 = vadd.xlane.f32.xlu0 %v618_v25  ;;  %644 = vadd.xlane.f32.xlu1 %v617_v26  ;;  %v1904_v18 = vpop.xlane.xlu0 %630  ;;  %v1910_v24 = vpop.xlane.xlu1 %636  ;;  %v654_v25 = vmul.f32 14.285714, %v623_v9 }
 0x14c   : > { %2616 = vst [vmem:[#allocation6_spill] sm:$0xff] %v1904_v18  ;;  %2618 = vst [vmem:[#allocation8_spill] sm:$0xff] %v1910_v24  ;;  %v655_v24 = vmul.f32 14.285714, %v625_v12 }
 0x14f   : > { %650 = vadd.xlane.f32.xlu0 %v620_v8  ;;  %648 = vadd.xlane.f32.xlu1 %v619_v29  ;;  %v1908_v20 = vpop.xlane.xlu0 %634 }
 0x150   : > { %2617 = vst [vmem:[#allocation7_spill] sm:$0xff] %v1908_v20 }
 0x153   : > { %652 = vadd.xlane.f32.xlu1 %v621_v36  ;;  %958 = vadd.xlane.f32.xlu0 %v926_v37 }
 0x157   : > { %962 = vadd.xlane.f32.xlu0 %v1857_v30  ;;  %960 = vadd.xlane.f32.xlu1 %v1859_v41 }
 0x15b   : > { %966 = vadd.xlane.f32.xlu0 %v1863_v31  ;;  %964 = vadd.xlane.f32.xlu1 %v1865_v42 }
 0x15f   : > { %970 = vadd.xlane.f32.xlu0 %v1869_v33  ;;  %968 = vadd.xlane.f32.xlu1 %v1871_v43 }
 0x163   : > { %974 = vadd.xlane.f32.xlu0 %v1875_v51  ;;  %972 = vadd.xlane.f32.xlu1 %v1877_v52 }
 0x167   : > { %978 = vadd.xlane.f32.xlu0 %v1881_v55  ;;  %976 = vadd.xlane.f32.xlu1 %v1883_v56 }
 0x16b   : > { %982 = vadd.xlane.f32.xlu0 %v1887_v59  ;;  %980 = vadd.xlane.f32.xlu1 %v1889_v60 }
 0x16f   : > { %986 = vadd.xlane.f32.xlu0 %v1893_v3  ;;  %984 = vadd.xlane.f32.xlu1 %v1895_v4 }
 0x173   : > { %988 = vadd.xlane.f32.xlu1 %v1899_v7 }
 0x1ac   : > { %v512_v26 = vpop.xlane.xlu0 %511 }
 0x1ad   : > { %v558_v27 = vsub.f32 %v1753_v44, %v512_v26  ;;  %v559_v28 = vsub.f32 %v1755_v45, %v512_v26  ;;  %v1914_v8 = vsub.f32 %v654_v25, %v512_v26  ;;  %v656_v26 = vmul.f32 14.285714, %v627_v13 }
 0x1af   : > { %2619 = vst [vmem:[#allocation9_spill] sm:$0xff] %v1914_v8  ;;  %v910_v29 = vadd.f32 %v559_v28, %v558_v27  ;;  %v686_v35 = vmul.f32 1.442695, %v558_v27  ;;  %v688_v18 = vmul.f32 1.442695, %v559_v28 }
 0x1b0   : > { %v1916_v36 = vpop.xlane.xlu1 %538  ;;  %v1918_v14 = vpop.xlane.xlu0 %535 }
 0x1b1   : > { %2620 = vst [vmem:[#allocation10_spill] sm:$0xff] %v1916_v36  ;;  %v1922_v20 = vsub.f32 %v1757_v48, %v1918_v14  ;;  %v1926_v9 = vsub.f32 %v1759_v49, %v1918_v14  ;;  %v1022_v44 = vmul.f32 %v926_v37, %v910_v29  ;;  %v1930_v45 = vsub.f32 %v1763_v53, %v1916_v36 }
 0x1b2   : > { %1426 = vpow2.f32 %v686_v35  ;;  %v1940_v53 = vsub.f32 %v1765_v54, %v1916_v36 }
 0x1b3   : > { %v718_v25 = vmul.f32 1.442695, %v1922_v20  ;;  %v720_v27 = vmul.f32 1.442695, %v1926_v9  ;;  %1038 = vadd.xlane.f32.xlu0 %v1022_v44  ;;  %1428 = vpow2.f32 %v688_v18  ;;  %v722_v35 = vmul.f32 1.442695, %v1930_v45 }
 0x1b4   : > { %v515_v28 = vpop.xlane.xlu0 %514  ;;  %v518_v48 = vpop.xlane.xlu1 %517 }
 0x1b5   : > { %v560_v8 = vsub.f32 %v1775_v61, %v515_v28  ;;  %v561_v49 = vsub.f32 %v1767_v57, %v515_v28  ;;  %v1936_v37 = vsub.f32 %v655_v24, %v515_v28  ;;  %v562_v12 = vsub.f32 %v1769_v58, %v518_v48 }
 0x1b6   : > { %v563_v13 = vsub.f32 %v1777_v0, %v518_v48  ;;  %v1944_v29 = vsub.f32 %v656_v26, %v518_v48  ;;  %1430 = vpow2.f32 %v718_v25  ;;  %v724_v25 = vmul.f32 1.442695, %v1940_v53 }
 0x1b7   : > { %v690_v18 = vmul.f32 1.442695, %v560_v8  ;;  %v692_v44 = vmul.f32 1.442695, %v561_v49  ;;  %1432 = vpow2.f32 %v720_v27  ;;  %v694_v61 = vmul.f32 1.442695, %v562_v12 }
 0x1b8   : > { %v696_v57 = vmul.f32 1.442695, %v563_v13  ;;  %v1947_v24 = vpop.xlane.xlu0 %541  ;;  %v1949_v28 = vpop.xlane.xlu1 %520  ;;  %v912_v27 = vadd.f32 %v563_v13, %v562_v12 }
 0x1b9   : > { %2621 = vst [vmem:[#allocation11_spill] sm:$0xff] %v1947_v24  ;;  %1434 = vpow2.f32 %v690_v18  ;;  %v1953_v54 = vsub.f32 %v1779_v1, %v1947_v24  ;;  %v1957_v58 = vsub.f32 %v1781_v2, %v1947_v24  ;;  %v564_v0 = vsub.f32 %v1787_v10, %v1949_v28 }
 0x1ba   : > { %1436 = vpow2.f32 %v692_v44  ;;  %v565_v26 = vsub.f32 %v1789_v11, %v1949_v28  ;;  %v1024_v2 = vmul.f32 %v1857_v30, %v912_v27  ;;  %v911_v10 = vadd.f32 %v561_v49, %v560_v8 }
 0x1bb   : > { %1438 = vpow2.f32 %v722_v35  ;;  %v726_v48 = vmul.f32 1.442695, %v1953_v54  ;;  %v728_v1 = vmul.f32 1.442695, %v1957_v58  ;;  %v698_v18 = vmul.f32 1.442695, %v564_v0 }
 0x1bc   : > { %1440 = vpow2.f32 %v694_v61  ;;  %v1967_v36 = vpop.xlane.xlu1 %544  ;;  %v1969_v24 = vpop.xlane.xlu0 %523  ;;  %v700_v12 = vmul.f32 1.442695, %v565_v26  ;;  %1042 = vadd.xlane.f32.xlu0 %v1024_v2  ;;  %v1023_v13 = vmul.f32 %v1859_v41, %v911_v10 }
 0x1bd   : > { %2622 = vst [vmem:[#allocation12_spill] sm:$0xff] %v1967_v36  ;;  %1442 = vpow2.f32 %v696_v57  ;;  %v1973_v44 = vsub.f32 %v1793_v15, %v1967_v36  ;;  %v1977_v11 = vsub.f32 %v1797_v17, %v1967_v36  ;;  %v1981_v30 = vsub.f32 %v1795_v16, %v1969_v24 }
 0x1be   : > { %1444 = vpow2.f32 %v724_v25  ;;  %v1986_v8 = vsub.f32 %v1801_v21, %v1969_v24  ;;  %v659_v15 = vmul.f32 14.285714, %v1906_v19  ;;  %1040 = vadd.xlane.f32.xlu1 %v1023_v13  ;;  %v913_v57 = vadd.f32 %v565_v26, %v564_v0 }
 0x1bf   : > { %1446 = vpow2.f32 %v726_v48  ;;  %v730_v17 = vmul.f32 1.442695, %v1973_v44  ;;  %v1427_v61 = vpop.eup %1426  ;;  %v732_v16 = vmul.f32 1.442695, %v1977_v11  ;;  %v702_v19 = vmul.f32 1.442695, %v1981_v30 }
 0x1c0   : > { %1448 = vpow2.f32 %v728_v1  ;;  %v1990_v49 = vpop.xlane.xlu0 %547  ;;  %v527_v35 = vpop.xlane.xlu1 %526  ;;  %v704_v48 = vmul.f32 1.442695, %v1986_v8  ;;  %v1025_v1 = vmul.f32 %v1865_v42, %v913_v57 }
 0x1c1   : > { %2623 = vst [vmem:[#allocation13_spill] sm:$0xff] %v1990_v49  ;;  %1450 = vpow2.f32 %v698_v18  ;;  %v1995_v41 = vsub.f32 %v1803_v22, %v1990_v49  ;;  %v1429_v21 = vpop.eup %1428  ;;  %v2000_v25 = vsub.f32 %v1805_v23, %v1990_v49  ;;  %v2002_v27 = vsub.f32 %v659_v15, %v527_v35 }
 0x1c2   : > { %1452 = vpow2.f32 %v700_v12  ;;  %v2007_v0 = vsub.f32 %v1811_v32, %v527_v35  ;;  %v2010_v22 = vsub.f32 %v1813_v34, %v527_v35  ;;  %1044 = vadd.xlane.f32.xlu1 %v1025_v1  ;;  %v750_v12 = vadd.f32 %v1429_v21, %v1427_v61 }
 0x1c3   : > { %v1431_v26 = vpop.eup %1430  ;;  %1454 = vpow2.f32 %v730_v17  ;;  %v734_v10 = vmul.f32 1.442695, %v1995_v41  ;;  %v736_v32 = vmul.f32 1.442695, %v2000_v25 }
 0x1c4   : > { %v2012_v18 = vpop.xlane.xlu1 %550  ;;  %v2014_v2 = vpop.xlane.xlu0 %529  ;;  %1456 = vpow2.f32 %v732_v16  ;;  %v706_v15 = vmul.f32 1.442695, %v2007_v0  ;;  %751 = vadd.xlane.f32.xlu0 %v750_v12  ;;  %v708_v61 = vmul.f32 1.442695, %v2010_v22 }
 0x1c5   : > { %2624 = vst [vmem:[#allocation14_spill] sm:$0xff] %v2012_v18  ;;  %v1433_v23 = vpop.eup %1432  ;;  %1458 = vpow2.f32 %v702_v19  ;;  %v2020_v42 = vsub.f32 %v1817_v38, %v2012_v18  ;;  %v2025_v17 = vsub.f32 %v1821_v40, %v2012_v18  ;;  %v2030_v57 = vsub.f32 %v1819_v39, %v2014_v2 }
 0x1c6   : > { %v1435_v13 = vpop.eup %1434  ;;  %1460 = vpow2.f32 %v704_v48  ;;  %v774_v35 = vadd.f32 %v1433_v23, %v1431_v26  ;;  %v2038_v48 = vsub.f32 %v1825_v46, %v2014_v2 }
 0x1c7   : > { %v1437_v34 = vpop.eup %1436  ;;  %1462 = vpow2.f32 %v734_v10  ;;  %v738_v1 = vmul.f32 1.442695, %v2020_v42  ;;  %v740_v39 = vmul.f32 1.442695, %v2025_v17  ;;  %v710_v10 = vmul.f32 1.442695, %v2030_v57 }
 0x1c8   : > { %v1439_v16 = vpop.eup %1438  ;;  %v2032_v21 = vpop.xlane.xlu0 %553  ;;  %1464 = vpow2.f32 %v736_v32  ;;  %v753_v26 = vadd.f32 %v1437_v34, %v1435_v13  ;;  %775 = vadd.xlane.f32.xlu0 %v774_v35  ;;  %v712_v34 = vmul.f32 1.442695, %v2038_v48 }
 0x1c9   : > { %2625 = vst [vmem:[#allocation15_spill] sm:$0xff] %v2032_v21  ;;  %v2034_v38 = vpop.xlane.xlu1 %532  ;;  %v1441_v19 = vpop.eup %1440  ;;  %1466 = vpow2.f32 %v706_v15  ;;  %v2044_v12 = vsub.f32 %v1827_v47, %v2032_v21  ;;  %v2049_v46 = vsub.f32 %v1829_v50, %v2032_v21 }
 0x1ca   : > { %v1443_v40 = vpop.eup %1442  ;;  %1468 = vpow2.f32 %v708_v61  ;;  %754 = vadd.xlane.f32.xlu1 %v753_v26  ;;  %v2054_v15 = vsub.f32 %v1835_v62, %v2034_v38  ;;  %v2058_v47 = vsub.f32 %v1837_v63, %v2034_v38 }
 0x1cb   : > { %v1445_v23 = vpop.eup %1444  ;;  %v756_v32 = vadd.f32 %v1443_v40, %v1441_v19  ;;  %1470 = vpow2.f32 %v738_v1  ;;  %v742_v19 = vmul.f32 1.442695, %v2044_v12  ;;  %v744_v26 = vmul.f32 1.442695, %v2049_v46 }
 0x1cc   : > { %v1447_v18 = vpop.eup %1446  ;;  %v777_v36 = vadd.f32 %v1445_v23, %v1439_v16  ;;  %1472 = vpow2.f32 %v740_v39  ;;  %v714_v1 = vmul.f32 1.442695, %v2054_v15  ;;  %v716_v16 = vmul.f32 1.442695, %v2058_v47 }
 0x1cd   : > { %v1449_v13 = vpop.eup %1448  ;;  %v2060_v61 = vpop.xlane.xlu1 %556  ;;  %757 = vadd.xlane.f32.xlu0 %v756_v32  ;;  %1474 = vpow2.f32 %v710_v10 }
 0x1ce   : > { %v1451_v35 = vpop.eup %1450  ;;  %2626 = vst [vmem:[#allocation16_spill] sm:$0xff] %v2060_v61  ;;  %v780_v40 = vadd.f32 %v1449_v13, %v1447_v18  ;;  %778 = vadd.xlane.f32.xlu1 %v777_v36  ;;  %1476 = vpow2.f32 %v712_v34  ;;  %v2067_v63 = vsub.f32 %v1842_v5, %v2060_v61  ;;  %v2072_v23 = vsub.f32 %v1844_v6, %v2060_v61 }
 0x1cf   : > { %v1453_v50 = vpop.eup %1452  ;;  %1478 = vpow2.f32 %v742_v19 }
 0x1d0   : > { %v1455_v62 = vpop.eup %1454  ;;  %v759_v18 = vadd.f32 %v1453_v50, %v1451_v35  ;;  %1480 = vpow2.f32 %v744_v26  ;;  %v746_v10 = vmul.f32 1.442695, %v2067_v63  ;;  %v748_v13 = vmul.f32 1.442695, %v2072_v23 }
 0x1d1   : > { %v1457_v21 = vpop.eup %1456  ;;  %781 = vadd.xlane.f32.xlu0 %v780_v40  ;;  %1482 = vpow2.f32 %v714_v1 }
 0x1d2   : > { %v1459_v39 = vpop.eup %1458  ;;  %760 = vadd.xlane.f32.xlu1 %v759_v18  ;;  %1484 = vpow2.f32 %v716_v16  ;;  %v783_v34 = vadd.f32 %v1457_v21, %v1455_v62 }
 0x1d3   : > { %v1461_v36 = vpop.eup %1460  ;;  %1486 = vpow2.f32 %v746_v10  ;;  %v914_v10 = vadd.f32 %v1986_v8, %v1981_v30  ;;  %v918_v30 = vadd.f32 %v1926_v9, %v1922_v20 }
 0x1d4   : > { %v762_v32 = vadd.f32 %v1461_v36, %v1459_v39  ;;  %v1463_v5 = vpop.eup %1462  ;;  %1488 = vpow2.f32 %v748_v13 }
 0x1d5   : > { %v1465_v49 = vpop.eup %1464  ;;  %v1026_v13 = vmul.f32 %v1863_v31, %v914_v10  ;;  %v1030_v31 = vmul.f32 %v1875_v51, %v918_v30  ;;  %v921_v51 = vadd.f32 %v1977_v11, %v1973_v44  ;;  %v639_v44 = vpop.xlane.xlu0 %638 }
 0x1d6   : > { %763 = vadd.xlane.f32.xlu0 %v762_v32  ;;  %v1467_v6 = vpop.eup %1466  ;;  %v786_v61 = vadd.f32 %v1465_v49, %v1463_v5  ;;  %784 = vadd.xlane.f32.xlu1 %v783_v34  ;;  %v916_v34 = vadd.f32 %v2038_v48, %v2030_v57  ;;  %v920_v57 = vadd.f32 %v1957_v58, %v1953_v54  ;;  %v641_v11 = vpop.xlane.xlu1 %640 }
 0x1d7   : > { %v1469_v35 = vpop.eup %1468  ;;  %v925_v58 = vadd.f32 %v2072_v23, %v2067_v63 }
 0x1d8   : > { %v765_v50 = vadd.f32 %v1469_v35, %v1467_v6  ;;  %v1471_v19 = vpop.eup %1470  ;;  %v915_v35 = vadd.f32 %v2010_v22, %v2007_v0  ;;  %v1032_v20 = vmul.f32 %v1881_v55, %v920_v57  ;;  %v923_v55 = vadd.f32 %v2025_v17, %v2020_v42 }
 0x1d9   : > { %v1473_v40 = vpop.eup %1472 }
 0x1da   : > { %787 = vadd.xlane.f32.xlu0 %v786_v61  ;;  %766 = vadd.xlane.f32.xlu1 %v765_v50  ;;  %v1475_v26 = vpop.eup %1474  ;;  %v789_v18 = vadd.f32 %v1473_v40, %v1471_v19  ;;  %v1028_v50 = vmul.f32 %v1869_v33, %v916_v34  ;;  %v1027_v8 = vmul.f32 %v1871_v43, %v915_v35  ;;  %v2631_v34 = vld [vmem:[#allocation8_spill] sm:$0xff]  ;;  %v802_v35 = vmul.f32 1.442695, %v1944_v29 }
 0x1db   : > { %v1477_v1 = vpop.eup %1476  ;;  %v917_v19 = vadd.f32 %v2058_v47, %v2054_v15  ;;  %v919_v33 = vadd.f32 %v1940_v53, %v1930_v45  ;;  %v922_v43 = vadd.f32 %v2000_v25, %v1995_v41  ;;  %v1033_v45 = vmul.f32 %v1889_v60, %v921_v51  ;;  %v643_v60 = vpop.xlane.xlu0 %642 }
 0x1dc   : > { %v768_v16 = vadd.f32 %v1477_v1, %v1475_v26  ;;  %v1479_v39 = vpop.eup %1478  ;;  %v645_v41 = vpop.xlane.xlu1 %644  ;;  %v2627_v26 = vld [vmem:[#allocation5_spill] sm:$0xff] }
 0x1dd   : > { %v1481_v21 = vpop.eup %1480  ;;  %v1029_v0 = vmul.f32 %v1877_v52, %v917_v19  ;;  %v1031_v9 = vmul.f32 %v1883_v56, %v919_v33  ;;  %v1034_v54 = vmul.f32 %v1887_v59, %v922_v43  ;;  %v924_v52 = vadd.f32 %v2049_v46, %v2044_v12 }
 0x1de   : > { %790 = vadd.xlane.f32.xlu1 %v789_v18  ;;  %769 = vadd.xlane.f32.xlu0 %v768_v16  ;;  %v1483_v62 = vpop.eup %1482  ;;  %v792_v36 = vadd.f32 %v1481_v21, %v1479_v39  ;;  %v1035_v56 = vmul.f32 %v1895_v4, %v923_v55  ;;  %v1037_v59 = vmul.f32 %v1899_v7, %v925_v58  ;;  %v657_v1 = vmul.f32 14.285714, %v2627_v26  ;;  %v2628_v16 = vld [vmem:[#allocation6_spill] sm:$0xff]  ;;  %v2634_v55 = vld [vmem:[#allocation13_spill] sm:$0xff]  ;;  %v2635_v58 = vld [vmem:[#allocation12_spill] sm:$0xff] }
 0x1df   : > { %v1485_v49 = vpop.eup %1484  ;;  %v1036_v53 = vmul.f32 %v1893_v3, %v924_v52  ;;  %v647_v25 = vpop.xlane.xlu0 %646  ;;  %v658_v39 = vmul.f32 14.285714, %v2628_v16 }
 0x1e0   : > { %v771_v32 = vadd.f32 %v1485_v49, %v1483_v62  ;;  %v1487_v5 = vpop.eup %1486  ;;  %v649_v22 = vpop.xlane.xlu1 %648  ;;  %v2133_v21 = vsub.f32 %v657_v1, %v1949_v28  ;;  %v2629_v62 = vld [vmem:[#allocation9_spill] sm:$0xff]  ;;  %v666_v57 = vmul.f32 14.285714, %v647_v25 }
 0x1e1   : > { %v1489_v61 = vpop.eup %1488  ;;  %v2137_v49 = vsub.f32 %v658_v39, %v1969_v24  ;;  %v2637_v39 = vld [vmem:[#allocation14_spill] sm:$0xff] }
 0x1e2   : > { %793 = vadd.xlane.f32.xlu0 %v792_v36  ;;  %772 = vadd.xlane.f32.xlu1 %v771_v32  ;;  %v795_v6 = vadd.f32 %v1489_v61, %v1487_v5  ;;  %v798_v36 = vmul.f32 1.442695, %v2629_v62  ;;  %v2630_v32 = vld [vmem:[#allocation7_spill] sm:$0xff]  ;;  %v800_v61 = vmul.f32 1.442695, %v1936_v37 }
 0x1e3   : > { %v651_v42 = vpop.xlane.xlu0 %650  ;;  %v660_v5 = vmul.f32 14.285714, %v2630_v32  ;;  %v804_v28 = vmul.f32 1.442695, %v2133_v21  ;;  %v806_v19 = vmul.f32 1.442695, %v2137_v49 }
 0x1e4   : > { %v653_v17 = vpop.xlane.xlu1 %652  ;;  %1490 = vpow2.f32 %v798_v36 }
 0x1e5   : > { %v2147_v30 = vsub.f32 %v660_v5, %v2014_v2  ;;  %1492 = vpow2.f32 %v800_v61  ;;  %v2632_v2 = vld [vmem:[#allocation11_spill] sm:$0xff]  ;;  %v669_v25 = vmul.f32 14.285714, %v653_v17  ;;  %v942_v17 = vld [vmem:[%s2601_s2] sm:$0xff] }
 0x1e6   : > { %1046 = vadd.xlane.f32.xlu0 %v1026_v13  ;;  %796 = vadd.xlane.f32.xlu1 %v795_v6  ;;  %v662_v13 = vmul.f32 14.285714, %v639_v44  ;;  %v661_v6 = vmul.f32 14.285714, %v2631_v34  ;;  %1494 = vpow2.f32 %v802_v35  ;;  %v943_v34 = vld [vmem:[%s2601_s2 + $0x8] sm:$0xff] }
 0x1e7   : > { %v959_v48 = vpop.xlane.xlu0 %958  ;;  %1496 = vpow2.f32 %v804_v28 }
 0x1e8   : > { %v961_v3 = vpop.xlane.xlu1 %960  ;;  %v2157_v33 = vsub.f32 %v662_v13, %v1918_v14  ;;  %1498 = vpow2.f32 %v806_v19  ;;  %v2170_v14 = vsub.f32 %v666_v57, %v2634_v55  ;;  %v944_v13 = vld [vmem:[%s2601_s2 + $0x10] sm:$0xff] }
 0x1e9   : > { %v2242_v55 = vld [vmem:[%s2601_s2 + $0x30] sm:$0xff] }
 0x1ea   : > { %1050 = vadd.xlane.f32.xlu0 %v1028_v50  ;;  %1048 = vadd.xlane.f32.xlu1 %v1027_v8  ;;  %v664_v50 = vmul.f32 14.285714, %v643_v60  ;;  %v663_v8 = vmul.f32 14.285714, %v641_v11  ;;  %v2636_v60 = vld [vmem:[#allocation15_spill] sm:$0xff] }
 0x1eb   : > { %v963_v12 = vpop.xlane.xlu0 %962  ;;  %v822_v16 = vmul.f32 1.442695, %v2170_v14 }
 0x1ec   : > { %v2112_v4 = vpop.xlane.xlu1 %964  ;;  %v2160_v43 = vsub.f32 %v664_v50, %v2632_v2  ;;  %v992_v1 = vmul.f32 2.0, %v963_v12  ;;  %v2639_v12 = vld [vmem:[#allocation16_spill] sm:$0xff] }
 0x1ed   : > { %v993_v19 = vmul.f32 2.0, %v2112_v4 }
 0x1ee   : > { %1054 = vadd.xlane.f32.xlu0 %v1030_v31  ;;  %1052 = vadd.xlane.f32.xlu1 %v1029_v0  ;;  %v2153_v31 = vsub.f32 %v661_v6, %v2034_v38  ;;  %v808_v0 = vmul.f32 1.442695, %v2002_v27  ;;  %v2633_v38 = vld [vmem:[#allocation10_spill] sm:$0xff]  ;;  %v818_v11 = vmul.f32 1.442695, %v2160_v43  ;;  %v2205_v6 = vsub.f32 %v992_v1, %v944_v13 }
 0x1ef   : > { %v2114_v46 = vpop.xlane.xlu0 %966  ;;  %v2166_v52 = vsub.f32 %v663_v8, %v2633_v38 }
 0x1f0   : > { %v2116_v15 = vpop.xlane.xlu1 %968  ;;  %1500 = vpow2.f32 %v808_v0  ;;  %v994_v35 = vmul.f32 2.0, %v2114_v46  ;;  %vm1136_vm1 = vcmp.eq.f32.partialorder %v2205_v6, 0.0 }
 0x1f1   : > { %v816_v26 = vmul.f32 1.442695, %v2166_v52  ;;  %v1491_v0 = vpop.eup %1490  ;;  %v995_v38 = vmul.f32 2.0, %v2116_v15 }
 0x1f2   : > { %1058 = vadd.xlane.f32.xlu0 %v1032_v20  ;;  %1056 = vadd.xlane.f32.xlu1 %v1031_v9  ;;  %v665_v20 = vmul.f32 14.285714, %v645_v41  ;;  %v668_v9 = vmul.f32 14.285714, %v651_v42  ;;  %v990_v42 = vmul.f32 2.0, %v959_v48  ;;  %v2217_v2 = vpop.eup %1492 }
 0x1f3   : > { %v2118_v47 = vpop.xlane.xlu0 %970 }
 0x1f4   : > { %v2120_v7 = vpop.xlane.xlu1 %972  ;;  %v2180_v41 = vsub.f32 %v668_v9, %v2636_v60  ;;  %v2197_v61 = vsub.f32 %v990_v42, %v942_v17  ;;  %v2224_v9 = vld [vmem:[%s2601_s2 + $0x20] sm:$0xff]  ;;  %v2259_v42 = vmul.f32 %v944_v13, %v1944_v29  ;;  %v2277_v29 = vmul.f32 %v943_v34, %v1936_v37 }
 0x1f5   : > { %v2230_v4 = vsub.f32 %v994_v35, %v2224_v9 }
 0x1f6   : > { %1062 = vadd.xlane.f32.xlu0 %v1034_v54  ;;  %1060 = vadd.xlane.f32.xlu1 %v1033_v45  ;;  %v810_v54 = vmul.f32 1.442695, %v2147_v30  ;;  %v812_v45 = vmul.f32 1.442695, %v2153_v31  ;;  %v826_v48 = vmul.f32 1.442695, %v2180_v41 }
 0x1f7   : > { %v2122_v63 = vpop.xlane.xlu0 %974  ;;  %vm1134_vm0 = vcmp.eq.f32.partialorder %v2197_v61, 0.0  ;;  %vm1138_vm3 = vcmp.eq.f32.partialorder %v2230_v4, 0.0 }
 0x1f8   : > { %v2124_v23 = vpop.xlane.xlu1 %976  ;;  %1502 = vpow2.f32 %v810_v54  ;;  %v2226_v54 = vpop.eup %1494  ;;  %v1150_v15 = vsel %vm1134_vm0, 1.0, %v2197_v61 }
 0x1f9   : > { %1504 = vpow2.f32 %v812_v45  ;;  %v2237_v45 = vpop.eup %1496 }
 0x1fa   : > { %1066 = vadd.xlane.f32.xlu0 %v1036_v53  ;;  %1064 = vadd.xlane.f32.xlu1 %v1035_v56  ;;  %v667_v53 = vmul.f32 14.285714, %v649_v22  ;;  %v814_v56 = vmul.f32 1.442695, %v2157_v33  ;;  %v991_v22 = vmul.f32 2.0, %v961_v3  ;;  %v2195_v3 = vsub.f32 %v669_v25, %v2639_v12  ;;  %v2250_v60 = vpop.eup %1498 }
 0x1fb   : > { %v2126_v40 = vpop.xlane.xlu0 %978 }
 0x1fc   : > { %v2129_v18 = vpop.xlane.xlu1 %980  ;;  %v2185_v36 = vsub.f32 %v667_v53, %v2637_v39  ;;  %1506 = vpow2.f32 %v814_v56  ;;  %2640 = vst [vmem:[#allocation6_spill] sm:$0xff] %v2195_v3  ;;  %v2208_v50 = vsub.f32 %v991_v22, %v943_v34  ;;  %v828_v46 = vmul.f32 1.442695, %v2195_v3  ;;  %v950_v39 = vld [vmem:[%s2601_s2 + $0x40] sm:$0xff] }
 0x1fd   : > { %1508 = vpow2.f32 %v818_v11  ;;  %v998_v56 = vmul.f32 2.0, %v2122_v63  ;;  %v2263_v63 = vpop.eup %1500  ;;  %v1000_v37 = vmul.f32 2.0, %v2126_v40  ;;  %v2303_v40 = vld [vmem:[%s2601_s2 + $0x38] sm:$0xff] }
 0x1fe   : > { %1068 = vadd.xlane.f32.xlu1 %v1037_v59  ;;  %v2174_v59 = vsub.f32 %v665_v20, %v2635_v58  ;;  %2638 = vst [vmem:[#allocation5_spill] sm:$0xff] %v2185_v36  ;;  %1510 = vpow2.f32 %v816_v26  ;;  %v824_v8 = vmul.f32 1.442695, %v2185_v36  ;;  %v996_v20 = vmul.f32 2.0, %v2118_v47  ;;  %v945_v47 = vld [vmem:[%s2601_s2 + $0x18] sm:$0xff] }
 0x1ff   : > { %v2139_v10 = vpop.xlane.xlu0 %982  ;;  %1512 = vpow2.f32 %v822_v16  ;;  %vm1135_vm2 = vcmp.eq.f32.partialorder %v2208_v50, 0.0  ;;  %v2244_v53 = vsub.f32 %v993_v19, %v945_v47  ;;  %v2248_v58 = vmul.f32 %v942_v17, %v2629_v62  ;;  %v2274_v16 = vld [vmem:[%s2601_s2 + $0x28] sm:$0xff] }
 0x200   : > { %v2149_v24 = vpop.xlane.xlu1 %984  ;;  %v820_v5 = vmul.f32 1.442695, %v2174_v59  ;;  %v2256_v25 = vsub.f32 %v996_v20, %v2242_v55  ;;  %v1152_v62 = vsel %vm1136_vm1, 1.0, %v2205_v6  ;;  %v1151_v22 = vsel %vm1135_vm2, 1.0, %v2208_v50 }
 0x201   : > { %v997_v17 = vmul.f32 2.0, %v2120_v7  ;;  %vm1137_vm4 = vcmp.eq.f32.partialorder %v2244_v53, 0.0  ;;  %v2290_v13 = vsub.f32 %v998_v56, %v950_v39  ;;  %v1154_v20 = vsel %vm1138_vm3, 1.0, %v2230_v4 }
 0x202   : > { %1514 = vpow2.f32 %v820_v5  ;;  %2641 = vst [vmem:[#allocation9_spill] sm:$0xff] %v2256_v25  ;;  %v2284_v5 = vsub.f32 %v995_v38, %v2274_v16  ;;  %vm1140_vm5 = vcmp.eq.f32.partialorder %v2256_v25, 0.0 }
 0x203   : > { %v2162_v51 = vpop.xlane.xlu0 %986  ;;  %1516 = vpow2.f32 %v826_v48  ;;  %vm1142_vm7 = vcmp.eq.f32.partialorder %v2290_v13, 0.0 }
 0x204   : > { %v2176_v44 = vpop.xlane.xlu1 %988  ;;  %1518 = vpow2.f32 %v824_v8  ;;  %v999_v8 = vmul.f32 2.0, %v2124_v23  ;;  %v1153_v23 = vsel %vm1137_vm4, 1.0, %v2244_v53  ;;  %vm1139_vm6 = vcmp.eq.f32.partialorder %v2284_v5, 0.0 }
 0x205   : > { %1520 = vpow2.f32 %v828_v46  ;;  %v2287_v12 = vpop.eup %1502  ;;  %v2306_v46 = vmul.f32 %v945_v47, %v2133_v21 }
 0x206   : > { %1522 = vrcp.f32 %v1150_v15  ;;  %v2293_v35 = vpop.eup %1504  ;;  %v2319_v15 = vsub.f32 %v997_v17, %v2303_v40 }
 0x207   : > { %1524 = vrcp.f32 %v1152_v62 }
 0x208   : > { %1526 = vrcp.f32 %v1151_v22  ;;  %vm1141_vm8 = vcmp.eq.f32.partialorder %v2319_v15, 0.0 }
 0x23c   : > { %v2187_v32 = vpop.xlane.xlu0 %1038 }
 0x245   : > { %v2214_v57 = vpop.xlane.xlu0 %1042 }
 0x247   : > { %v2210_v28 = vpop.xlane.xlu1 %1040 }
 0x24b   : > { %v2261_v26 = vpop.xlane.xlu1 %1044 }
 0x24d   : > { %v752_v11 = vpop.xlane.xlu0 %751 }
 0x24e   : > { %v830_v1 = vsub.f32 %v752_v11, %v1491_v0  ;;  %v1507_v0 = vpop.eup %1506  ;;  %v952_v11 = vld [vmem:[%s2601_s2 + $0x50] sm:$0xff] }
 0x24f   : > { %v2309_v56 = vpop.eup %1508  ;;  %v2325_v47 = vsub.f32 %v1000_v37, %v952_v11  ;;  %v2340_v37 = vmul.f32 %v2224_v9, %v2137_v49 }
 0x250   : > { %v846_v48 = vmax.f32 %v830_v1, 0.0  ;;  %v1511_v21 = vpop.eup %1510  ;;  %v2330_v1 = vld [vmem:[%s2601_s2 + $0x48] sm:$0xff] }
 0x251   : > { %v776_v34 = vpop.xlane.xlu0 %775  ;;  %v2335_v17 = vsub.f32 %v999_v8, %v2330_v1  ;;  %vm1144_vm9 = vcmp.eq.f32.partialorder %v2325_v47, 0.0  ;;  %v2356_v8 = vmul.f32 %v2242_v55, %v2147_v30 }
 0x252   : > { %v862_v19 = vadd.f32 1e-09, %v846_v48  ;;  %v2332_v48 = vpop.eup %1512 }
 0x253   : > { %v755_v7 = vpop.xlane.xlu1 %754  ;;  %v2342_v3 = vpop.eup %1514  ;;  %vm1143_vm10 = vcmp.eq.f32.partialorder %v2335_v17, 0.0 }
 0x254   : > { %v831_v38 = vsub.f32 %v755_v7, %v2217_v2  ;;  %1528 = vlog2.f32 %v862_v19  ;;  %v1156_v2 = vsel %vm1140_vm5, 1.0, %v2256_v25  ;;  %v838_v25 = vsub.f32 %v776_v34, %v1507_v0  ;;  %v2347_v36 = vpop.eup %1516 }
 0x255   : > { %1530 = vrcp.f32 %v1154_v20  ;;  %v2359_v34 = vmul.f32 %v950_v39, %v2157_v33  ;;  %v2361_v0 = vpop.eup %1518  ;;  %v1160_v33 = vsel %vm1144_vm9, 1.0, %v2325_v47 }
 0x256   : > { %v758_v62 = vpop.xlane.xlu0 %757  ;;  %v847_v22 = vmax.f32 %v831_v38, 0.0  ;;  %1532 = vrcp.f32 %v1153_v23  ;;  %v1155_v38 = vsel %vm1139_vm6, 1.0, %v2284_v5  ;;  %v2367_v55 = vpop.eup %1520 }
 0x257   : > { %v832_v19 = vsub.f32 %v758_v62, %v2226_v54  ;;  %v779_v7 = vpop.xlane.xlu1 %778  ;;  %1534 = vrcp.f32 %v1156_v2  ;;  %v1158_v54 = vsel %vm1142_vm7, 1.0, %v2290_v13 }
 0x258   : > { %v863_v20 = vadd.f32 1e-09, %v847_v22  ;;  %v839_v2 = vsub.f32 %v779_v7, %v1511_v21  ;;  %v1157_v22 = vsel %vm1141_vm8, 1.0, %v2319_v15  ;;  %v954_v21 = vld [vmem:[%s2601_s2 + $0x60] sm:$0xff]  ;;  %v1001_v7 = vmul.f32 2.0, %v2129_v18 }
 0x259   : > { %v848_v49 = vmax.f32 %v832_v19, 0.0  ;;  %v854_v19 = vmax.f32 %v838_v25, 0.0  ;;  %v1002_v25 = vmul.f32 2.0, %v2139_v10  ;;  %v2393_v10 = vmul.f32 %v952_v11, %v2160_v43 }
 0x25a   : > { %1536 = vlog2.f32 %v863_v20  ;;  %v782_v9 = vpop.xlane.xlu0 %781  ;;  %v855_v20 = vmax.f32 %v839_v2, 0.0  ;;  %v2409_v11 = vmul.f32 %v954_v21, %v2170_v14 }
 0x25b   : > { %1538 = vrcp.f32 %v1155_v38  ;;  %v864_v23 = vadd.f32 1e-09, %v848_v49  ;;  %v761_v62 = vpop.xlane.xlu1 %760  ;;  %v840_v39 = vsub.f32 %v782_v9, %v2309_v56  ;;  %v2375_v38 = vmul.f32 %v2274_v16, %v2002_v27  ;;  %v1523_v16 = vpop.eup %1522 }
 0x25c   : > { %1540 = vrcp.f32 %v1158_v54  ;;  %v833_v30 = vsub.f32 %v761_v62, %v2237_v45  ;;  %v1159_v45 = vsel %vm1143_vm10, 1.0, %v2335_v17  ;;  %v2395_v9 = vpop.eup %1524  ;;  %v870_v18 = vadd.f32 1e-09, %v854_v19 }
 0x25d   : > { %1542 = vlog2.f32 %v864_v23  ;;  %v2399_v62 = vmul.f32 %v2303_v40, %v2153_v31  ;;  %v856_v2 = vmax.f32 %v840_v39, 0.0  ;;  %v2411_v19 = vsub.f32 %v1002_v25, %v954_v21 }
 0x25e   : > { %v849_v27 = vmax.f32 %v833_v30, 0.0  ;;  %1544 = vrcp.f32 %v1157_v22  ;;  %v2401_v30 = vpop.eup %1526  ;;  %v1086_v25 = vsub.f32 %v2187_v32, %v2248_v58  ;;  %v1004_v32 = vmul.f32 2.0, %v2162_v51 }
 0x25f   : > { %v764_v56 = vpop.xlane.xlu0 %763  ;;  %v785_v49 = vpop.xlane.xlu1 %784  ;;  %1546 = vrcp.f32 %v1160_v33  ;;  %vm1146_vm12 = vcmp.eq.f32.partialorder %v2411_v19, 0.0 }
 0x260   : > { %v834_v54 = vsub.f32 %v764_v56, %v2250_v60  ;;  %v865_v23 = vadd.f32 1e-09, %v849_v27  ;;  %1548 = vrcp.f32 %v1159_v45  ;;  %v2406_v60 = vld [vmem:[%s2601_s2 + $0x58] sm:$0xff]  ;;  %v841_v40 = vsub.f32 %v785_v49, %v2342_v3 }
 0x261   : > { %v1529_v22 = vpop.eup %1528  ;;  %v2414_v33 = vsub.f32 %v1001_v7, %v2406_v60  ;;  %v871_v45 = vadd.f32 1e-09, %v855_v20  ;;  %v872_v49 = vadd.f32 1e-09, %v856_v2 }
 0x262   : > { %v850_v43 = vmax.f32 %v834_v54, 0.0  ;;  %1550 = vlog2.f32 %v865_v23  ;;  %v879_v39 = vmul.f32 0.6931472, %v1529_v22  ;;  %v2424_v21 = vpop.eup %1530  ;;  %v2431_v54 = vmul.f32 %v2330_v1, %v2166_v52 }
 0x263   : > { %v788_v31 = vpop.xlane.xlu0 %787  ;;  %v767_v27 = vpop.xlane.xlu1 %766  ;;  %1552 = vlog2.f32 %v870_v18  ;;  %v857_v58 = vmax.f32 %v841_v40, 0.0  ;;  %vm1145_vm13 = vcmp.eq.f32.partialorder %v2414_v33, 0.0  ;;  %v1003_v52 = vmul.f32 2.0, %v2149_v24 }
 0x264   : > { %v866_v56 = vadd.f32 1e-09, %v850_v43  ;;  %v842_v14 = vsub.f32 %v788_v31, %v2332_v48  ;;  %v835_v7 = vsub.f32 %v767_v27, %v2263_v63  ;;  %v2433_v3 = vpop.eup %1532  ;;  %v1102_v20 = vmul.f32 %v2197_v61, %v879_v39 }
 0x265   : > { %v2436_v23 = vpop.eup %1534  ;;  %v1087_v40 = vsub.f32 %v2210_v28, %v2277_v29  ;;  %v2460_v28 = vsel %vm1146_vm12, 1.0, %v2411_v19 }
 0x266   : > { %1554 = vlog2.f32 %v866_v56  ;;  %v858_v48 = vmax.f32 %v842_v14, 0.0  ;;  %v851_v18 = vmax.f32 %v835_v7, 0.0  ;;  %v1118_v1 = vsub.f32 %v1086_v25, %v1102_v20 }
 0x267   : > { %v1537_v63 = vpop.eup %1536  ;;  %1556 = vlog2.f32 %v871_v45  ;;  %v791_v61 = vpop.xlane.xlu1 %790  ;;  %v873_v25 = vadd.f32 1e-09, %v857_v58  ;;  %v1005_v20 = vmul.f32 2.0, %v2176_v44 }
 0x268   : > { %v2443_v2 = vpop.eup %1538  ;;  %v881_v43 = vmul.f32 0.6931472, %v1537_v63  ;;  %v874_v22 = vadd.f32 1e-09, %v858_v48  ;;  %v770_v31 = vpop.xlane.xlu0 %769  ;;  %v867_v39 = vadd.f32 1e-09, %v851_v18  ;;  %v843_v56 = vsub.f32 %v791_v61, %v2361_v0 }
 0x269   : > { %v2446_v51 = vpop.eup %1540  ;;  %v1167_v14 = vmul.f32 %v1523_v16, %v1118_v1  ;;  %1558 = vlog2.f32 %v872_v49  ;;  %v836_v24 = vsub.f32 %v770_v31, %v2287_v12  ;;  %v956_v18 = vld [vmem:[%s2601_s2 + $0x70] sm:$0xff]  ;;  %v1088_v63 = vsub.f32 %v2214_v57, %v2259_v42 }
 0x26a   : > { %v1543_v27 = vpop.eup %1542  ;;  %v1103_v45 = vmul.f32 %v2208_v50, %v881_v43  ;;  %1560 = vlog2.f32 %v867_v39  ;;  %v859_v0 = vmax.f32 %v843_v56, 0.0  ;;  %v2478_v31 = vsub.f32 %v1004_v32, %v956_v18  ;;  %v2483_v39 = vld [vmem:[%s2601_s2 + $0x68] sm:$0xff]  ;;  %v2493_v32 = vld [vmem:[%s2601_s2 + $0x78] sm:$0xff] }
 0x26b   : > { %v1198_v29 = vsub.f32 0.0, %v1167_v14  ;;  %v883_v16 = vmul.f32 0.6931472, %v1543_v27  ;;  %v852_v12 = vmax.f32 %v836_v24, 0.0  ;;  %v2462_v7 = vpop.eup %1544  ;;  %1562 = vlog2.f32 %v874_v22  ;;  %v773_v43 = vpop.xlane.xlu1 %772 }
 0x26c   : > { %v1119_v49 = vsub.f32 %v1087_v40, %v1103_v45  ;;  %v794_v48 = vpop.xlane.xlu0 %793  ;;  %v875_v50 = vadd.f32 1e-09, %v859_v0  ;;  %v2465_v58 = vpop.eup %1546  ;;  %1564 = vlog2.f32 %v873_v25  ;;  %v837_v57 = vsub.f32 %v773_v43, %v2293_v35 }
 0x26d   : > { %1215 = vst.msk [vmem:[%s2454_s15] sm:$0xff] %vm1214_vm11, %v1198_v29  ;;  %v1104_v1 = vmul.f32 %v2205_v6, %v883_v16  ;;  %v868_v61 = vadd.f32 1e-09, %v852_v12  ;;  %v844_v44 = vsub.f32 %v794_v48, %v2347_v36  ;;  %v2476_v22 = vpop.eup %1548  ;;  %v2488_v6 = vsub.f32 %v1003_v52, %v2483_v39 }
 0x26e   : > { %v1169_v56 = vmul.f32 %v2401_v30, %v1119_v49  ;;  %v853_v27 = vmax.f32 %v837_v57, 0.0  ;;  %v1161_v35 = vsel %vm1145_vm13, 1.0, %v2414_v33  ;;  %v2499_v52 = vsub.f32 %v1005_v20, %v2493_v32 }
 0x26f   : > { %v1551_v42 = vpop.eup %1550  ;;  %v1120_v36 = vsub.f32 %v1088_v63, %v1104_v1  ;;  %1566 = vlog2.f32 %v868_v61  ;;  %v860_v40 = vmax.f32 %v844_v44, 0.0  ;;  %v797_v29 = vpop.xlane.xlu1 %796  ;;  %v1089_v12 = vsub.f32 %v2261_v26, %v2306_v46 }
 0x270   : > { %v1199_v14 = vsub.f32 0.0, %v1169_v56  ;;  %v885_v24 = vmul.f32 0.6931472, %v1551_v42  ;;  %1568 = vlog2.f32 %v875_v50  ;;  %v1047_v30 = vpop.xlane.xlu0 %1046  ;;  %v1553_v45 = vpop.eup %1552  ;;  %v869_v48 = vadd.f32 1e-09, %v853_v27 }
 0x271   : > { %v1171_v25 = vmul.f32 %v2395_v9, %v1120_v36  ;;  %v876_v0 = vadd.f32 1e-09, %v860_v40  ;;  %v845_v50 = vsub.f32 %v797_v29, %v2367_v55  ;;  %vm1148_vm14 = vcmp.eq.f32.partialorder %v2478_v31, 0.0 }
 0x272   : > { %1216 = vst.msk [vmem:[%s2454_s15 + $0x8] sm:$0xff] %vm1214_vm11, %v1199_v14  ;;  %v1105_v49 = vmul.f32 %v2244_v53, %v885_v24  ;;  %vm1147_vm15 = vcmp.eq.f32.partialorder %v2488_v6, 0.0  ;;  %vm1149_vm0 = vcmp.eq.f32.partialorder %v2499_v52, 0.0  ;;  %v895_v46 = vmul.f32 0.6931472, %v1553_v45 }
 0x273   : > { %v1555_v16 = vpop.eup %1554  ;;  %v1200_v20 = vsub.f32 0.0, %v1171_v25  ;;  %1570 = vlog2.f32 %v876_v0  ;;  %v861_v26 = vmax.f32 %v845_v50, 0.0  ;;  %v1090_v55 = vsub.f32 %v1047_v30, %v2340_v37  ;;  %v1049_v44 = vpop.xlane.xlu1 %1048 }
 0x274   : > { %v887_v63 = vmul.f32 0.6931472, %v1555_v16  ;;  %v1557_v9 = vpop.eup %1556  ;;  %v1121_v1 = vsub.f32 %v1089_v12, %v1105_v49  ;;  %1572 = vlog2.f32 %v869_v48  ;;  %v2510_v61 = vpop.xlane.xlu0 %1050  ;;  %v2520_v42 = vmul.f32 %v956_v18, %v2180_v41 }
 0x275   : > { %1217 = vst.msk [vmem:[%s2454_s15 + $0x10] sm:$0xff] %vm1214_vm11, %v1200_v20  ;;  %1574 = vrcp.f32 %v2460_v28  ;;  %v877_v57 = vadd.f32 1e-09, %v861_v26  ;;  %v1164_v40 = vsel %vm1148_vm14, 1.0, %v2478_v31  ;;  %v1110_v27 = vmul.f32 %v2290_v13, %v895_v46  ;;  %v2643_v20 = vld [vmem:[#allocation5_spill] sm:$0xff] }
 0x276   : > { %v1106_v53 = vmul.f32 %v2230_v4, %v887_v63  ;;  %v1559_v43 = vpop.eup %1558  ;;  %v1173_v56 = vmul.f32 %v2433_v3, %v1121_v1  ;;  %1576 = vrcp.f32 %v1161_v35  ;;  %v1163_v4 = vsel %vm1147_vm15, 1.0, %v2488_v6 }
 0x277   : > { %v1561_v36 = vpop.eup %1560  ;;  %v1165_v3 = vsel %vm1149_vm0, 1.0, %v2499_v52  ;;  %1578 = vlog2.f32 %v877_v57  ;;  %v899_v24 = vmul.f32 0.6931472, %v1559_v43  ;;  %v2534_v35 = vpop.xlane.xlu1 %1052  ;;  %v897_v25 = vmul.f32 0.6931472, %v1557_v9 }
 0x278   : > { %v1122_v37 = vsub.f32 %v1090_v55, %v1106_v53  ;;  %v1201_v28 = vsub.f32 0.0, %v1173_v56  ;;  %v889_v14 = vmul.f32 0.6931472, %v1561_v36  ;;  %v1055_v41 = vpop.xlane.xlu0 %1054  ;;  %v1563_v18 = vpop.eup %1562  ;;  %1580 = vrcp.f32 %v1164_v40  ;;  %v2644_v55 = vld [vmem:[#allocation9_spill] sm:$0xff] }
 0x279   : > { %v1094_v45 = vsub.f32 %v1055_v41, %v2359_v34  ;;  %v1091_v29 = vsub.f32 %v1049_v44, %v2375_v38  ;;  %v1565_v16 = vpop.eup %1564  ;;  %1582 = vrcp.f32 %v1163_v4  ;;  %v1081_v13 = vmul.f32 %v2406_v60, %v2174_v59 }
 0x27a   : > { %v1175_v30 = vmul.f32 %v2424_v21, %v1122_v37  ;;  %1218 = vst.msk [vmem:[%s2454_s15 + $0x18] sm:$0xff] %vm1214_vm11, %v1201_v28  ;;  %v1107_v0 = vmul.f32 %v2284_v5, %v889_v14  ;;  %1584 = vrcp.f32 %v1165_v3  ;;  %v903_v34 = vmul.f32 0.6931472, %v1563_v18 }
 0x27b   : > { %v1126_v49 = vsub.f32 %v1094_v45, %v1110_v27  ;;  %v2544_v63 = vmul.f32 %v2483_v39, %v2643_v20  ;;  %v1112_v1 = vmul.f32 %v2325_v47, %v899_v24  ;;  %v1057_v59 = vpop.xlane.xlu1 %1056  ;;  %v901_v60 = vmul.f32 0.6931472, %v1565_v16  ;;  %v2645_v20 = vld [vmem:[#allocation6_spill] sm:$0xff] }
 0x27c   : > { %v1202_v12 = vsub.f32 0.0, %v1175_v30  ;;  %v1567_v21 = vpop.eup %1566  ;;  %v1123_v48 = vsub.f32 %v1091_v29, %v1107_v0  ;;  %v1059_v50 = vpop.xlane.xlu0 %1058  ;;  %v1111_v53 = vmul.f32 %v2335_v17, %v897_v25  ;;  %v1095_v39 = vsub.f32 %v1057_v59, %v2431_v54 }
 0x27d   : > { %v1569_v9 = vpop.eup %1568  ;;  %v891_v5 = vmul.f32 0.6931472, %v1567_v21  ;;  %v1183_v38 = vmul.f32 %v2446_v51, %v1126_v49  ;;  %v1096_v26 = vsub.f32 %v1059_v50, %v2393_v10  ;;  %v1092_v43 = vsub.f32 %v2510_v61, %v2356_v8 }
 0x27e   : > { %1219 = vst.msk [vmem:[%s2454_s15 + $0x20] sm:$0xff] %vm1214_vm11, %v1202_v12  ;;  %v1177_v46 = vmul.f32 %v2443_v2, %v1123_v48  ;;  %v905_v57 = vmul.f32 0.6931472, %v1569_v9  ;;  %v1114_v36 = vmul.f32 %v2411_v19, %v903_v34  ;;  %v1127_v2 = vsub.f32 %v1095_v39, %v1111_v53 }
 0x27f   : > { %v1108_v44 = vmul.f32 %v2644_v55, %v891_v5  ;;  %v1206_v56 = vsub.f32 0.0, %v1183_v38  ;;  %v1128_v51 = vsub.f32 %v1096_v26, %v1112_v1  ;;  %v1061_v8 = vpop.xlane.xlu1 %1060  ;;  %v1113_v19 = vmul.f32 %v2414_v33, %v901_v60 }
 0x280   : > { %v1571_v47 = vpop.eup %1570  ;;  %v1203_v10 = vsub.f32 0.0, %v1177_v46  ;;  %v1063_v40 = vpop.xlane.xlu0 %1062  ;;  %v1185_v28 = vmul.f32 %v2476_v22, %v1127_v2  ;;  %v1097_v14 = vsub.f32 %v1061_v8, %v1081_v13  ;;  %v1093_v30 = vsub.f32 %v2534_v35, %v2399_v62 }
 0x281   : > { %v1573_v4 = vpop.eup %1572  ;;  %v907_v37 = vmul.f32 0.6931472, %v1571_v47  ;;  %v1124_v17 = vsub.f32 %v1092_v43, %v1108_v44  ;;  %1223 = vst.msk [vmem:[%s2454_s15 + $0x40] sm:$0xff] %vm1214_vm11, %v1206_v56  ;;  %v1187_v54 = vmul.f32 %v2465_v58, %v1128_v51  ;;  %v1098_v3 = vsub.f32 %v1063_v40, %v2409_v11 }
 0x282   : > { %v893_v61 = vmul.f32 0.6931472, %v1573_v4  ;;  %1220 = vst.msk [vmem:[%s2454_s15 + $0x28] sm:$0xff] %vm1214_vm11, %v1203_v10  ;;  %v1575_v41 = vpop.eup %1574  ;;  %v1207_v45 = vsub.f32 0.0, %v1185_v28  ;;  %v1129_v22 = vsub.f32 %v1097_v14, %v1113_v19  ;;  %v1115_v0 = vmul.f32 %v2488_v6, %v905_v57 }
 0x283   : > { %v1179_v18 = vmul.f32 %v2436_v23, %v1124_v17  ;;  %v1208_v24 = vsub.f32 0.0, %v1187_v54  ;;  %v1130_v58 = vsub.f32 %v1098_v3, %v1114_v36  ;;  %v1577_v11 = vpop.eup %1576  ;;  %v1116_v16 = vmul.f32 %v2478_v31, %v907_v37  ;;  %v1065_v35 = vpop.xlane.xlu1 %1064 }
 0x284   : > { %v1109_v27 = vmul.f32 %v2319_v15, %v893_v61  ;;  %v1067_v25 = vpop.xlane.xlu0 %1066  ;;  %v1579_v33 = vpop.eup %1578  ;;  %1224 = vst.msk [vmem:[%s2454_s15 + $0x48] sm:$0xff] %vm1214_vm11, %v1207_v45  ;;  %v1189_v15 = vmul.f32 %v1577_v11, %v1129_v22  ;;  %v1099_v13 = vsub.f32 %v1065_v35, %v2544_v63  ;;  %v1085_v9 = vmul.f32 %v2493_v32, %v2645_v20 }
 0x285   : > { %v1204_v29 = vsub.f32 0.0, %v1179_v18  ;;  %1225 = vst.msk [vmem:[%s2454_s15 + $0x50] sm:$0xff] %vm1214_vm11, %v1208_v24  ;;  %v1191_v23 = vmul.f32 %v1575_v41, %v1130_v58  ;;  %v1100_v62 = vsub.f32 %v1067_v25, %v2520_v42  ;;  %v909_v12 = vmul.f32 0.6931472, %v1579_v33  ;;  %v1581_v6 = vpop.eup %1580 }
 0x286   : > { %v1125_v49 = vsub.f32 %v1093_v30, %v1109_v27  ;;  %v1583_v48 = vpop.eup %1582  ;;  %v1209_v42 = vsub.f32 0.0, %v1189_v15  ;;  %v1131_v50 = vsub.f32 %v1099_v13, %v1115_v0 }
 0x287   : > { %1221 = vst.msk [vmem:[%s2454_s15 + $0x30] sm:$0xff] %vm1214_vm11, %v1204_v29  ;;  %v1210_v21 = vsub.f32 0.0, %v1191_v23  ;;  %v1132_v34 = vsub.f32 %v1100_v62, %v1116_v16  ;;  %v1585_v5 = vpop.eup %1584  ;;  %v1069_v38 = vpop.xlane.xlu1 %1068  ;;  %v1117_v59 = vmul.f32 %v2499_v52, %v909_v12 }
 0x288   : > { %v1181_v31 = vmul.f32 %v2462_v7, %v1125_v49  ;;  %1226 = vst.msk [vmem:[%s2454_s15 + $0x58] sm:$0xff] %vm1214_vm11, %v1209_v42  ;;  %v1193_v26 = vmul.f32 %v1583_v48, %v1131_v50  ;;  %v1101_v7 = vsub.f32 %v1069_v38, %v1085_v9 }
 0x289   : > { %1227 = vst.msk [vmem:[%s2454_s15 + $0x60] sm:$0xff] %vm1214_vm11, %v1210_v21  ;;  %v1195_v63 = vmul.f32 %v1581_v6, %v1132_v34 }
 0x28a   : > { %v1205_v1 = vsub.f32 0.0, %v1181_v31  ;;  %v1211_v46 = vsub.f32 0.0, %v1193_v26  ;;  %v1133_v53 = vsub.f32 %v1101_v7, %v1117_v59 }
 0x28b   : > { %v1212_v60 = vsub.f32 0.0, %v1195_v63 }
 0x28c   : > { %1222 = vst.msk [vmem:[%s2454_s15 + $0x38] sm:$0xff] %vm1214_vm11, %v1205_v1  ;;  %1228 = vst.msk [vmem:[%s2454_s15 + $0x68] sm:$0xff] %vm1214_vm11, %v1211_v46  ;;  %v1197_v32 = vmul.f32 %v1585_v5, %v1133_v53 }
 0x28d   : > { %1229 = vst.msk [vmem:[%s2454_s15 + $0x70] sm:$0xff] %vm1214_vm11, %v1212_v60 }
 0x28e   : > { %v1213_v39 = vsub.f32 0.0, %v1197_v32 }
 0x290   : > { %1230 = vst.msk [vmem:[%s2454_s15 + $0x78] sm:$0xff] %vm1214_vm11, %v1213_v39 }
 0x291 PF: > { %s14_s12 = sadd.s32 1, %s1622_s12  }
 0x292   : > { %p11_p1 = scmp.ge.s32.totalorder %s14_s12, 4  }
 0x294   :  { %13 = sbr.rel (!%p11_p1) target bundleno = 1 (0x1), region = 65 }
 0x299   :  { %1253 = vsyncpa [#allocation3], 1 }
 0x29a   :  { %1255 = vsyncpa [#allocation3 + $0x1], 1 }

</bundles_post_ra>
